<compile_context>
chip_gen: v7x
topology: tpu7x:2x2x1
jax: 0.10.0
libtpu: 0.0.40
codegen_flags: <defaults>
</compile_context>

<pallas_src>
import functools

import jax
import jax.numpy as jnp
from jax.experimental import pallas as pl
from jax.experimental.pallas import tpu as pltpu


LANE = 128


def _round_up(n, m):
    return (n + m - 1) // m * m


def mlp_kernel(x_ref, w1_ref, b1_ref, w2_ref, b2_ref, w3_ref, b3_ref, o_ref,
               *, square_dtype):
    # Whole 3-layer MLP for one batch tile. Matmuls hit the MXU with bf16 operands and
    # f32 accumulation; bias adds stay f32; the square activations run in `square_dtype`
    # (bf16 on v6e/v7x to halve VPU/vreg/spill traffic, f32 on v5e).
    x = x_ref[...].astype(jnp.bfloat16)          # in-kernel cast: no extra HBM pass

    h1 = jnp.dot(x, w1_ref[...], preferred_element_type=jnp.float32) + b1_ref[...]
    h1 = h1.astype(square_dtype)
    h1 = h1 * h1                                 # square activation

    h2 = jnp.dot(h1.astype(jnp.bfloat16), w2_ref[...],
                 preferred_element_type=jnp.float32) + b2_ref[...]
    h2 = h2.astype(square_dtype)
    h2 = h2 * h2                                 # square activation

    out = jnp.dot(h2.astype(jnp.bfloat16), w3_ref[...],
                  preferred_element_type=jnp.float32) + b3_ref[...]
    o_ref[...] = out.astype(o_ref.dtype)


def _pick_block_m(batch, block_m):
    """Batch-tile size: as large as `block_m`, but (a) never (much) larger than the batch
    and (b) small enough that the grid has >= 2 parallel steps when the batch allows it
    (so both v7x TensorCores stay busy)."""
    bm = min(block_m, max(_round_up(pl.cdiv(batch, 2), LANE), LANE))
    bm = min(bm, _round_up(batch, 8))
    return max(bm, 8)


@functools.partial(jax.jit, static_argnames=("block_m", "out_features", "square_in_bf16"))
def fully_connected_net(x, packed_params, *, block_m=1024, out_features=10,
                        square_in_bf16=True):
    """x: (B, 1, 28, 28) or (B, 784) float32; packed_params from pack_params().
    Returns (B, out_features) float32.
    square_in_bf16: keep True on v6e/v7x; set False on v5e (no bf16 VPU)."""
    w1, b1, w2, b2, w3, b3 = packed_params
    d_in, d_h1 = w1.shape            # 784, 1024
    d_h2_p = w2.shape[1]             # 128 (hidden padded to lane width)
    d_out_p = w3.shape[1]            # 128 (output padded to lane width)

    x2d = x.reshape(-1, d_in)        # stays f32; the bf16 cast happens inside the kernel
    B = x2d.shape[0]
    bm = _pick_block_m(B, block_m)
    grid = (pl.cdiv(B, bm),)         # ragged last batch tile is masked by Pallas

    cost = pl.CostEstimate(
        flops=2 * B * (d_in * d_h1 + d_h1 * d_h2_p + d_h2_p * d_out_p),
        transcendentals=0,
        bytes_accessed=(x2d.size * 4
                        + (w1.size + w2.size + w3.size) * 2
                        + (b1.size + b2.size + b3.size) * 4
                        + B * d_out_p * 4),
    )

    kernel = functools.partial(
        mlp_kernel,
        square_dtype=jnp.bfloat16 if square_in_bf16 else jnp.float32)

    out = pl.pallas_call(
        kernel,
        out_shape=jax.ShapeDtypeStruct((B, d_out_p), jnp.float32),
        grid_spec=pltpu.PrefetchScalarGridSpec(
            num_scalar_prefetch=0,
            grid=grid,
            in_specs=[
                pl.BlockSpec((bm, d_in), lambda i: (i, 0)),         # x tile (f32)
                pl.BlockSpec((d_in, d_h1), lambda i: (0, 0)),       # W1 (VMEM-resident)
                pl.BlockSpec((1, d_h1), lambda i: (0, 0)),          # b1
                pl.BlockSpec((d_h1, d_h2_p), lambda i: (0, 0)),     # W2
                pl.BlockSpec((1, d_h2_p), lambda i: (0, 0)),        # b2
                pl.BlockSpec((d_h2_p, d_out_p), lambda i: (0, 0)),  # W3
                pl.BlockSpec((1, d_out_p), lambda i: (0, 0)),       # b3
            ],
            out_specs=pl.BlockSpec((bm, d_out_p), lambda i: (i, 0)),
        ),
        compiler_params=pltpu.CompilerParams(
            dimension_semantics=("parallel",),
            vmem_limit_bytes=32 * 1024 * 1024,
        ),
        cost_estimate=cost,
    )(x2d, w1, b1, w2, b2, w3, b3)

    return out[:, :out_features]


def init_params(key, hidden=64, output=10):
    """Deterministic init mimicking torch.nn.Linear default (uniform +-1/sqrt(fan_in)).
    Weights stored as (in_features, out_features), i.e. torch weight.T."""
    def linear(k, fan_in, fan_out):
        kw, kb = jax.random.split(k)
        bound = 1.0 / jnp.sqrt(fan_in)
        w = jax.random.uniform(kw, (fan_in, fan_out), jnp.float32, -bound, bound)
        b = jax.random.uniform(kb, (1, fan_out), jnp.float32, -bound, bound)
        return w, b

    k1, k2, k3 = jax.random.split(key, 3)
    w1, b1 = linear(k1, 784, 1024)
    w2, b2 = linear(k2, 1024, hidden)
    w3, b3 = linear(k3, hidden, output)
    return (w1, b1, w2, b2, w3, b3)


def pack_params(params):
    """Pad hidden/output dims to lane width (128) and cast weights to bf16.
    Zero padding is inert; the wrapper slices the output back to (B, out_features)."""
    w1, b1, w2, b2, w3, b3 = params
    d_h2 = w2.shape[1]
    d_out = w3.shape[1]
    d_h2_p = _round_up(d_h2, LANE)
    d_out_p = _round_up(d_out, LANE)

    w1p = w1.astype(jnp.bfloat16)                                   # K stays at 784
    w2p = jnp.pad(w2, ((0, 0), (0, d_h2_p - d_h2))).astype(jnp.bfloat16)
    w3p = jnp.pad(w3, ((0, d_h2_p - d_h2), (0, d_out_p - d_out))).astype(jnp.bfloat16)
    b1p = b1.astype(jnp.float32)
    b2p = jnp.pad(b2, ((0, 0), (0, d_h2_p - d_h2))).astype(jnp.float32)
    b3p = jnp.pad(b3, ((0, 0), (0, d_out_p - d_out))).astype(jnp.float32)
    return (w1p, b1p, w2p, b2p, w3p, b3p)


def reference_forward_f32(x, params):
    """Pure-f32 math, identical to the PyTorch module (loose sanity reference only)."""
    w1, b1, w2, b2, w3, b3 = params
    h = x.reshape(-1, 784)
    h = h @ w1 + b1
    h = h * h
    h = h @ w2 + b2
    h = h * h
    return h @ w3 + b3


def reference_forward_emulated(x, params, square_in_bf16=True):
    """Emulates the kernel numerics exactly: bf16 matmul operands, f32 accumulation,
    f32 bias add, square in bf16 (or f32 if square_in_bf16=False)."""
    w1, b1, w2, b2, w3, b3 = params
    bf = jnp.bfloat16
    sq = bf if square_in_bf16 else jnp.float32
    h = x.reshape(-1, 784).astype(bf)
    h = jnp.dot(h, w1.astype(bf), preferred_element_type=jnp.float32) + b1
    h = h.astype(sq)
    h = (h * h).astype(bf)
    h = jnp.dot(h, w2.astype(bf), preferred_element_type=jnp.float32) + b2
    h = h.astype(sq)
    h = (h * h).astype(bf)
    return jnp.dot(h, w3.astype(bf), preferred_element_type=jnp.float32) + b3


if __name__ == "__main__":
    key = jax.random.PRNGKey(0)
    kx, kp = jax.random.split(key)

    batch = 8  # small demo batch; the wrapper picks a matching tile and masks ragged tiles
    x = jax.random.normal(kx, (batch, 1, 28, 28), jnp.float32)
    params = init_params(kp, hidden=64, output=10)
    packed = pack_params(params)

    out = fully_connected_net(x, packed, out_features=10)
    out = jax.block_until_ready(out)
    assert out.shape == (batch, 10), out.shape

    # Authoritative check: reference with identical numerics (bf16 operands, f32 accum,
    # bf16 squares). The pure-f32 reference is only reported, not asserted, because the
    # two square activations amplify bf16 operand error multiplicatively.
    ref = reference_forward_emulated(x, params, square_in_bf16=True)
    max_diff = float(jnp.max(jnp.abs(out - ref)))
    assert jnp.allclose(out, ref, atol=2e-2, rtol=2e-2), (
        f"mismatch vs bf16-emulated reference, max abs diff = {max_diff}")

    ref_f32 = reference_forward_f32(x, params)
    _ = float(jnp.max(jnp.abs(out - ref_f32)))  # informational only

    print("KERNEL_OK")
</pallas_src>

<mosaic_0001>
module attributes {stable_mosaic.version = 11 : i64} {
  func.func @mlp_kernel(%arg0: i32, %arg1: memref<8x784xf32, #tpu.memory_space<vmem>>, %arg2: memref<784x1024xbf16, #tpu.memory_space<vmem>>, %arg3: memref<1x1024xf32, #tpu.memory_space<vmem>>, %arg4: memref<1024x128xbf16, #tpu.memory_space<vmem>>, %arg5: memref<1x128xf32, #tpu.memory_space<vmem>>, %arg6: memref<128x128xbf16, #tpu.memory_space<vmem>>, %arg7: memref<1x128xf32, #tpu.memory_space<vmem>>, %arg8: memref<8x128xf32, #tpu.memory_space<vmem>>) attributes {dimension_semantics = [#tpu.dimension_semantics<parallel>], iteration_bounds = array<i64: 1>, scalar_prefetch = 0 : i64, scratch_operands = 0 : i64, tpu.core_type = #tpu.core_type<tc>, window_params = [{transform_indices = @transform_0, window_bounds = array<i64: 8, 784>}, {pipeline_mode = #tpu.pipeline_mode<synchronous>, transform_indices = @transform_1, window_bounds = array<i64: 784, 1024>}, {pipeline_mode = #tpu.pipeline_mode<synchronous>, transform_indices = @transform_2, window_bounds = array<i64: 1, 1024>}, {pipeline_mode = #tpu.pipeline_mode<synchronous>, transform_indices = @transform_3, window_bounds = array<i64: 1024, 128>}, {pipeline_mode = #tpu.pipeline_mode<synchronous>, transform_indices = @transform_4, window_bounds = array<i64: 1, 128>}, {pipeline_mode = #tpu.pipeline_mode<synchronous>, transform_indices = @transform_5, window_bounds = array<i64: 128, 128>}, {pipeline_mode = #tpu.pipeline_mode<synchronous>, transform_indices = @transform_6, window_bounds = array<i64: 1, 128>}, {transform_indices = @transform_7, window_bounds = array<i64: 8, 128>}]} {
    %c0 = arith.constant 0 : index
    %c0_0 = arith.constant 0 : index
    %0 = vector.load %arg1[%c0, %c0_0] : memref<8x784xf32, #tpu.memory_space<vmem>>, vector<8x784xf32>
    %1 = arith.truncf %0 : vector<8x784xf32> to vector<8x784xbf16>
    %c0_1 = arith.constant 0 : index
    %c0_2 = arith.constant 0 : index
    %2 = vector.load %arg2[%c0_1, %c0_2] : memref<784x1024xbf16, #tpu.memory_space<vmem>>, vector<784x1024xbf16>
    %cst = arith.constant dense<0.000000e+00> : vector<8x1024xf32>
    %3 = tpu.matmul %1, %2, %cst {dimension_numbers = #tpu.dot_dimension_numbers<[1], [0], [0], [1], [0, 0, 1, 1], [], []>} : vector<8x784xbf16>, vector<784x1024xbf16>, vector<8x1024xf32> -> vector<8x1024xf32>
    %c0_3 = arith.constant 0 : index
    %c0_4 = arith.constant 0 : index
    %4 = vector.load %arg3[%c0_3, %c0_4] : memref<1x1024xf32, #tpu.memory_space<vmem>>, vector<1x1024xf32>
    %5 = vector.broadcast %4 : vector<1x1024xf32> to vector<8x1024xf32>
    %6 = arith.addf %3, %5 : vector<8x1024xf32>
    %7 = arith.truncf %6 : vector<8x1024xf32> to vector<8x1024xbf16>
    %8 = arith.mulf %7, %7 : vector<8x1024xbf16>
    %c0_5 = arith.constant 0 : index
    %c0_6 = arith.constant 0 : index
    %9 = vector.load %arg4[%c0_5, %c0_6] : memref<1024x128xbf16, #tpu.memory_space<vmem>>, vector<1024x128xbf16>
    %cst_7 = arith.constant dense<0.000000e+00> : vector<8x128xf32>
    %10 = tpu.matmul %8, %9, %cst_7 {dimension_numbers = #tpu.dot_dimension_numbers<[1], [0], [0], [1], [0, 0, 1, 1], [], []>} : vector<8x1024xbf16>, vector<1024x128xbf16>, vector<8x128xf32> -> vector<8x128xf32>
    %c0_8 = arith.constant 0 : index
    %c0_9 = arith.constant 0 : index
    %11 = vector.load %arg5[%c0_8, %c0_9] : memref<1x128xf32, #tpu.memory_space<vmem>>, vector<1x128xf32>
    %12 = vector.broadcast %11 : vector<1x128xf32> to vector<8x128xf32>
    %13 = arith.addf %10, %12 : vector<8x128xf32>
    %14 = arith.truncf %13 : vector<8x128xf32> to vector<8x128xbf16>
    %15 = arith.mulf %14, %14 : vector<8x128xbf16>
    %c0_10 = arith.constant 0 : index
    %c0_11 = arith.constant 0 : index
    %16 = vector.load %arg6[%c0_10, %c0_11] : memref<128x128xbf16, #tpu.memory_space<vmem>>, vector<128x128xbf16>
    %cst_12 = arith.constant dense<0.000000e+00> : vector<8x128xf32>
    %17 = tpu.matmul %15, %16, %cst_12 {dimension_numbers = #tpu.dot_dimension_numbers<[1], [0], [0], [1], [0, 0, 1, 1], [], []>} : vector<8x128xbf16>, vector<128x128xbf16>, vector<8x128xf32> -> vector<8x128xf32>
    %c0_13 = arith.constant 0 : index
    %c0_14 = arith.constant 0 : index
    %18 = vector.load %arg7[%c0_13, %c0_14] : memref<1x128xf32, #tpu.memory_space<vmem>>, vector<1x128xf32>
    %19 = vector.broadcast %18 : vector<1x128xf32> to vector<8x128xf32>
    %20 = arith.addf %17, %19 : vector<8x128xf32>
    %c0_15 = arith.constant 0 : index
    %c0_16 = arith.constant 0 : index
    %21 = vector.load %arg8[%c0_15, %c0_16] : memref<8x128xf32, #tpu.memory_space<vmem>>, vector<8x128xf32>
    tpu.vector_store %arg8[%c0_15, %c0_16], %20 {strides = array<i32>} : memref<8x128xf32, #tpu.memory_space<vmem>>, vector<8x128xf32>,
    return
  }
  func.func @transform_0(%arg0: i32) -> (i32, i32) {
    %c0_i32 = arith.constant 0 : i32
    %c0_i32_0 = arith.constant 0 : i32
    return %arg0, %c0_i32 : i32, i32
  }
  func.func @transform_1(%arg0: i32) -> (i32, i32) {
    %c0_i32 = arith.constant 0 : i32
    %c0_i32_0 = arith.constant 0 : i32
    %c0_i32_1 = arith.constant 0 : i32
    return %c0_i32, %c0_i32_0 : i32, i32
  }
  func.func @transform_2(%arg0: i32) -> (i32, i32) {
    %c0_i32 = arith.constant 0 : i32
    %c0_i32_0 = arith.constant 0 : i32
    %c0_i32_1 = arith.constant 0 : i32
    return %c0_i32, %c0_i32_0 : i32, i32
  }
  func.func @transform_3(%arg0: i32) -> (i32, i32) {
    %c0_i32 = arith.constant 0 : i32
    %c0_i32_0 = arith.constant 0 : i32
    %c0_i32_1 = arith.constant 0 : i32
    return %c0_i32, %c0_i32_0 : i32, i32
  }
  func.func @transform_4(%arg0: i32) -> (i32, i32) {
    %c0_i32 = arith.constant 0 : i32
    %c0_i32_0 = arith.constant 0 : i32
    %c0_i32_1 = arith.constant 0 : i32
    return %c0_i32, %c0_i32_0 : i32, i32
  }
  func.func @transform_5(%arg0: i32) -> (i32, i32) {
    %c0_i32 = arith.constant 0 : i32
    %c0_i32_0 = arith.constant 0 : i32
    %c0_i32_1 = arith.constant 0 : i32
    return %c0_i32, %c0_i32_0 : i32, i32
  }
  func.func @transform_6(%arg0: i32) -> (i32, i32) {
    %c0_i32 = arith.constant 0 : i32
    %c0_i32_0 = arith.constant 0 : i32
    %c0_i32_1 = arith.constant 0 : i32
    return %c0_i32, %c0_i32_0 : i32, i32
  }
  func.func @transform_7(%arg0: i32) -> (i32, i32) {
    %c0_i32 = arith.constant 0 : i32
    %c0_i32_0 = arith.constant 0 : i32
    return %arg0, %c0_i32 : i32, i32
  }
}

</mosaic_0001>

<bundles_post_ra>
// kernel: fully_connected_net.1
= control target key start
LH: loop header
LB: loop body
LE: loop exit
PB: predicated region body
PF: predicated region fallthrough
CT: control target
= control target key end

     0   :  { %12 = vsyncpa [#allocation3], 0  ;;  %s5129_s0 = inlined_call_operand.vmem [shape: f32[8,784], index: 0, kind: input, shape index: {}]   ;;  %s5130_s1 = inlined_call_operand.hbm [shape: bf16[784,1024], index: 1, kind: input, shape index: {}]   ;;  %s5131_s2 = inlined_call_operand.hbm [shape: f32[1,1024], index: 2, kind: input, shape index: {}]   ;;  %s5132_s3 = inlined_call_operand.hbm [shape: bf16[1024,128], index: 3, kind: input, shape index: {}]   ;;  %s5133_s4 = inlined_call_operand.hbm [shape: f32[1,128], index: 4, kind: input, shape index: {}]   ;;  %s5134_s5 = inlined_call_operand.hbm [shape: bf16[128,128], index: 5, kind: input, shape index: {}]   ;;  %s5135_s6 = inlined_call_operand.hbm [shape: f32[1,128], index: 6, kind: input, shape index: {}]   ;;  %s5136_s7 = inlined_call_operand.hbm [shape: f32[8,128], index: 7, kind: output, shape index: {}]  }
   0x1   :  { %13 = vsyncpa [#allocation6], 0 }
   0x2   :  { %14 = vsyncpa [#allocation9], 0 }
   0x3   :  { %15 = vsyncpa [#allocation12], 0 }
   0x4   :  { %16 = vsyncpa [#allocation4], 0  ;;  %s4888_s24 = smov [#allocation5]   ;;  %s4889_s26 = smov [#allocation8]  }
   0x5   :  { %s37_s25 = sshll.u32 %s4888_s24, 4  ;;  %s59_s27 = sshll.u32 %s4889_s26, 4  ;;  %s38_s25 = int_to_ptr.vmem [resolvable:$true] %s37_s25  ;;  %s60_s27 = int_to_ptr.vmem [resolvable:$true] %s59_s27 }
   0x6   :  { %s4724_s30 = scalar_lea.hbm %s5131_s2, 128 }
   0x7   :  { %p4725_p0 = scmp.ne.s32.totalorder %s5131_s2, %s4724_s30  ;;  %p4728_p1 = scmp.lt.u32.totalorder %s4724_s30, %s5131_s2 }
   0x9   :  { %p4730_p2 = pnand %p4728_p1, %p4725_p0 }
   0xb   :  { %4733 = shalt.err (!%p4730_p2)
}
   0xc   :  { %s4734_s12 = scalar_lea.vmem %s38_s25, 128  ;;  %p4739_p4 = scmp.lt.s32.totalorder %s38_s25, %s38_s25 }
   0xd   :  { %p4735_p3 = scmp.ne.s32.totalorder %s38_s25, %s4734_s12  ;;  %p4740_p5 = scmp.lt.s32.totalorder %s4734_s12, %s4734_s12 }
   0xf   :  { %p4741_p6 = por %p4740_p5, %p4739_p4 }
  0x11   :  { %p4742_p7 = pnand %p4741_p6, %p4735_p3 }
  0x13   :  { %4745 = shalt.err (!%p4742_p7)
}
  0x14   :  { %40 = dma.hbm_to_vmem [thread:$0]  %s5131_s2, 128, %s38_s25, [#allocation6]  }
  0x15   :  { %s4746_s17 = scalar_lea.hbm %s5133_s4, 16 }
  0x16   :  { %p4747_p8 = scmp.ne.s32.totalorder %s5133_s4, %s4746_s17  ;;  %p4750_p9 = scmp.lt.u32.totalorder %s4746_s17, %s5133_s4 }
  0x18   :  { %p4752_p10 = pnand %p4750_p9, %p4747_p8 }
  0x1a   :  { %4755 = shalt.err (!%p4752_p10)
}
  0x1b   :  { %s4756_s22 = scalar_lea.vmem %s60_s27, 16  ;;  %s4760_s23 = scalar_lea.vmem %s60_s27, 32 }
  0x1c   :  { %p4757_p11 = scmp.ne.s32.totalorder %s60_s27, %s4756_s22  ;;  %p4761_p12 = scmp.lt.s32.totalorder %s60_s27, %s60_s27 }
  0x1d   :  { %p4762_p13 = scmp.lt.s32.totalorder %s4760_s23, %s4756_s22 }
  0x1f   :  { %p4763_p0 = por %p4762_p13, %p4761_p12 }
  0x21   :  { %p4764_p1 = pnand %p4763_p0, %p4757_p11 }
  0x23   :  { %4767 = shalt.err (!%p4764_p1)
}
  0x24   :  { %62 = dma.hbm_to_vmem [thread:$0]  %s5133_s4, 16, %s60_s27, [#allocation9]  }
  0x25   :  { %s4890_s25 = smov [#allocation2]   ;;  %s4768_s30 = scalar_lea.hbm %s5130_s1, 50176 }
  0x26   :  { %s24_s26 = sshll.u32 %s4890_s25, 4  ;;  %p4769_p2 = scmp.ne.s32.totalorder %s5130_s1, %s4768_s30  ;;  %s25_s26 = int_to_ptr.vmem [resolvable:$true] %s24_s26 }
  0x27   :  { %p4772_p3 = scmp.lt.u32.totalorder %s4768_s30, %s5130_s1 }
  0x29   :  { %p4774_p4 = pnand %p4772_p3, %p4769_p2 }
  0x2b   :  { %4777 = shalt.err (!%p4774_p4)
}
  0x2c   :  { %s4778_s12 = scalar_lea.vmem %s25_s26, 50176  ;;  %p4783_p6 = scmp.lt.s32.totalorder %s25_s26, %s25_s26 }
  0x2d   :  { %p4779_p5 = scmp.ne.s32.totalorder %s25_s26, %s4778_s12  ;;  %p4784_p7 = scmp.lt.s32.totalorder %s4778_s12, %s4778_s12 }
  0x2f   :  { %p4785_p8 = por %p4784_p7, %p4783_p6 }
  0x31   :  { %p4786_p9 = pnand %p4785_p8, %p4779_p5 }
  0x33   :  { %4789 = shalt.err (!%p4786_p9)
}
  0x34   :  { %s4891_s4 = smov 512   ;;  %s4892_s27 = smov 32  }
  0x35   :  { %30 = dma.hbm_to_vmem [thread:$0]  %s5130_s1, 50176, %s25_s26, [#allocation3], %s4891_s4, %s4891_s4, %s4892_s27  }
  0x36   :  { %s4893_s15 = smov [#allocation7]   ;;  %s4790_s19 = scalar_lea.hbm %s5132_s3, 8192 }
  0x37   :  { %s46_s16 = sshll.u32 %s4893_s15, 4  ;;  %p4791_p10 = scmp.ne.s32.totalorder %s5132_s3, %s4790_s19  ;;  %s47_s16 = int_to_ptr.vmem [resolvable:$true] %s46_s16 }
  0x38   :  { %p4794_p11 = scmp.lt.u32.totalorder %s4790_s19, %s5132_s3 }
  0x3a   :  { %p4796_p12 = pnand %p4794_p11, %p4791_p10 }
  0x3c   :  { %4799 = shalt.err (!%p4796_p12)
}
  0x3d   :  { %s4800_s2 = scalar_lea.vmem %s47_s16, 8192  ;;  %p4805_p0 = scmp.lt.s32.totalorder %s47_s16, %s47_s16 }
  0x3e   :  { %p4801_p13 = scmp.ne.s32.totalorder %s47_s16, %s4800_s2  ;;  %p4806_p1 = scmp.lt.s32.totalorder %s4800_s2, %s4800_s2 }
  0x40   :  { %p4807_p2 = por %p4806_p1, %p4805_p0 }
  0x42   :  { %p4808_p3 = pnand %p4807_p2, %p4801_p13 }
  0x44   :  { %4811 = shalt.err (!%p4808_p3)
}
  0x45   :  { %s4894_s1 = smov 64   ;;  %s4895_s24 = smov 4  }
  0x46   :  { %52 = dma.hbm_to_vmem [thread:$0]  %s5132_s3, 8192, %s47_s16, [#allocation6], %s4894_s1, %s4894_s1, %s4895_s24  }
  0x47   :  { %s4896_s28 = smov [#allocation10]   ;;  %s4897_s30 = smov [#allocation11]  }
  0x48   :  { %s68_s29 = sshll.u32 %s4896_s28, 4  ;;  %s81_s8 = sshll.u32 %s4897_s30, 4  ;;  %s69_s29 = int_to_ptr.vmem [resolvable:$true] %s68_s29  ;;  %s82_s8 = int_to_ptr.vmem [resolvable:$true] %s81_s8 }
  0x49   :  { %s4812_s11 = scalar_lea.hbm %s5134_s5, 1024 }
  0x4a   :  { %p4813_p4 = scmp.ne.s32.totalorder %s5134_s5, %s4812_s11  ;;  %p4816_p5 = scmp.lt.u32.totalorder %s4812_s11, %s5134_s5 }
  0x4c   :  { %p4818_p6 = pnand %p4816_p5, %p4813_p4 }
  0x4e   :  { %4821 = shalt.err (!%p4818_p6)
}
  0x4f   :  { %s4822_s3 = scalar_lea.vmem %s69_s29, 1024  ;;  %p4827_p8 = scmp.lt.s32.totalorder %s69_s29, %s69_s29 }
  0x50   :  { %p4823_p7 = scmp.ne.s32.totalorder %s69_s29, %s4822_s3  ;;  %p4828_p9 = scmp.lt.s32.totalorder %s4822_s3, %s4822_s3 }
  0x52   :  { %p4829_p10 = por %p4828_p9, %p4827_p8 }
  0x54   :  { %p4830_p11 = pnand %p4829_p10, %p4823_p7 }
  0x56   :  { %4833 = shalt.err (!%p4830_p11)
}
  0x57   :  { %74 = dma.hbm_to_vmem [thread:$0]  %s5134_s5, 1024, %s69_s29, [#allocation9], %s4894_s1, %s4894_s1, %s4895_s24  }
  0x58   :  { %s4834_s18 = scalar_lea.hbm %s5135_s6, 16 }
  0x59   :  { %p4835_p12 = scmp.ne.s32.totalorder %s5135_s6, %s4834_s18  ;;  %p4838_p13 = scmp.lt.u32.totalorder %s4834_s18, %s5135_s6 }
  0x5b   :  { %p4840_p0 = pnand %p4838_p13, %p4835_p12 }
  0x5d   :  { %4843 = shalt.err (!%p4840_p0)
}
  0x5e   :  { %s4844_s23 = scalar_lea.vmem %s82_s8, 16  ;;  %s4848_s2 = scalar_lea.vmem %s82_s8, 32 }
  0x5f   :  { %p4845_p1 = scmp.ne.s32.totalorder %s82_s8, %s4844_s23  ;;  %p4849_p2 = scmp.lt.s32.totalorder %s82_s8, %s82_s8 }
  0x60   :  { %p4850_p3 = scmp.lt.s32.totalorder %s4848_s2, %s4844_s23 }
  0x62   :  { %p4851_p4 = por %p4850_p3, %p4849_p2 }
  0x64   :  { %p4852_p5 = pnand %p4851_p4, %p4845_p1 }
  0x66   :  { %4855 = shalt.err (!%p4852_p5)
}
  0x67   :  { %84 = dma.hbm_to_vmem [thread:$0]  %s5135_s6, 16, %s82_s8, [#allocation12]  }
  0x68   :  { %4878 = dma.done.wait [#allocation3], 50176  }
  0x69   :  { %4879 = vsyncadd [#allocation3], 4294917120 }
  0x6a   :  { %4880 = dma.done.wait [#allocation6], 8320  }
  0x6b   :  { %4881 = vsyncadd [#allocation6], 4294958976 }
  0x6c   :  { %4882 = dma.done.wait [#allocation9], 1040  }
  0x6d   :  { %4883 = vsyncadd [#allocation9], 4294966256 }
  0x6e   :  { %4884 = dma.done.wait [#allocation12], 16  }
  0x6f   :  { %4885 = vsyncadd [#allocation12], 4294967280  ;;  %v4898_v0 = vmov 0   ;;  %v118_v1 = vld [vmem:[#allocation2] sm:$0xff]  ;;  %v110_v12 = vld [vmem:[%s5129_s0 + $0x30] sm:$0xff]  ;;  %vm2512_vm0 = vcmask 130048  }
  0x70   :  { %2671 = vmatprep.mubr.bf16.mxu1 %v4898_v0  ;;  %v122_v2 = vld [vmem:[#allocation2 + $0x20] sm:$0xff]  ;;  %v119_v13 = vld [vmem:[#allocation2 + $0x8] sm:$0xff]  ;;  %v5018_v19 = vpack.c.bf16 %v110_v12, %v110_v12  ;;  %vm4900_vm1 = vmmov 0  }
  0x71   :  { %v502_v3 = vld [vmem:[#allocation2 + $0xc00] sm:$0xff]  ;;  %v4000_v4 = vcombine.high %v118_v1, %v122_v2  ;;  %v3999_v6 = vcombine.low %v118_v1, %v122_v2  ;;  %v123_v14 = vld [vmem:[#allocation2 + $0x28] sm:$0xff] }
  0x72   :  { %v506_v5 = vld [vmem:[#allocation2 + $0xc20] sm:$0xff]  ;;  %v4002_v15 = vcombine.high %v119_v13, %v123_v14  ;;  %v127_v18 = vld [vmem:[#allocation2 + $0x48] sm:$0xff]  ;;  %v4001_v22 = vcombine.low %v119_v13, %v123_v14 }
  0x73   :  { %v126_v7 = vld [vmem:[#allocation2 + $0x40] sm:$0xff]  ;;  %v4384_v9 = vcombine.high %v502_v3, %v506_v5  ;;  %v4383_v10 = vcombine.low %v502_v3, %v506_v5  ;;  %2516 = vmatprep.subr.bf16.mxu0 %v4000_v4  ;;  %v131_v21 = vld [vmem:[#allocation2 + $0x68] sm:$0xff] }
  0x74   :  { %v130_v8 = vld [vmem:[#allocation2 + $0x60] sm:$0xff]  ;;  %2517 = vmatpush1.bf16.msra.mxu0 %v3999_v6  ;;  %v4010_v24 = vcombine.high %v127_v18, %v131_v21  ;;  %v135_v27 = vld [vmem:[#allocation2 + $0x88] sm:$0xff]  ;;  %v4009_v30 = vcombine.low %v127_v18, %v131_v21 }
  0x75   :  { %v4008_v11 = vcombine.high %v126_v7, %v130_v8  ;;  %v134_v16 = vld [vmem:[#allocation2 + $0x80] sm:$0xff]  ;;  %2639 = vmatprep.subr.bf16.mxu1 %v4384_v9  ;;  %v4007_v20 = vcombine.low %v126_v7, %v130_v8  ;;  %v139_v28 = vld [vmem:[#allocation2 + $0xa8] sm:$0xff] }
  0x76   :  { %v138_v17 = vld [vmem:[#allocation2 + $0xa0] sm:$0xff]  ;;  %2640 = vmatpush1.bf16.msra.mxu1 %v4383_v10  ;;  %v4018_v32 = vcombine.high %v135_v27, %v139_v28  ;;  %v143_v35 = vld [vmem:[#allocation2 + $0xc8] sm:$0xff]  ;;  %v4017_v38 = vcombine.low %v135_v27, %v139_v28 }
  0x77   :  { %2518 = vmatprep.subr.bf16.mxu0 %v4008_v11  ;;  %v4016_v23 = vcombine.high %v134_v16, %v138_v17  ;;  %2680 = vmatprep.subr.bf16.mxu1 %v4002_v15  ;;  %v142_v25 = vld [vmem:[#allocation2 + $0xc0] sm:$0xff]  ;;  %v4015_v29 = vcombine.low %v134_v16, %v138_v17  ;;  %v147_v36 = vld [vmem:[#allocation2 + $0xe8] sm:$0xff] }
  0x78   :  { %v146_v26 = vld [vmem:[#allocation2 + $0xe0] sm:$0xff]  ;;  %2519 = vmatpush1.bf16.msra.mxu0 %v4007_v20  ;;  %v4026_v40 = vcombine.high %v143_v35, %v147_v36  ;;  %v151_v43 = vld [vmem:[#allocation2 + $0x108] sm:$0xff]  ;;  %v4025_v46 = vcombine.low %v143_v35, %v147_v36 }
  0x79   :  { %4391 = vmatmul.mubr.msk.bf16.vlgmr.msra.gmra.mrb[0].mxu1 %vm2512_vm0, %v5018_v19  ;;  %2520 = vmatprep.subr.bf16.mxu0 %v4016_v23  ;;  %v4024_v31 = vcombine.high %v142_v25, %v146_v26  ;;  %v150_v33 = vld [vmem:[#allocation2 + $0x100] sm:$0xff]  ;;  %v4023_v37 = vcombine.low %v142_v25, %v146_v26  ;;  %v155_v44 = vld [vmem:[#allocation2 + $0x128] sm:$0xff] }
  0x7a   :  { %2681 = vmatpush1.bf16.msra.mxu1 %v4001_v22  ;;  %v154_v34 = vld [vmem:[#allocation2 + $0x120] sm:$0xff]  ;;  %v4034_v48 = vcombine.high %v151_v43, %v155_v44  ;;  %v159_v51 = vld [vmem:[#allocation2 + $0x148] sm:$0xff]  ;;  %v4033_v54 = vcombine.low %v151_v43, %v155_v44 }
  0x7b   :  { %2682 = vmatprep.subr.bf16.mxu1 %v4010_v24  ;;  %v4032_v39 = vcombine.high %v150_v33, %v154_v34  ;;  %v158_v41 = vld [vmem:[#allocation2 + $0x140] sm:$0xff]  ;;  %v4031_v45 = vcombine.low %v150_v33, %v154_v34  ;;  %v163_v52 = vld [vmem:[#allocation2 + $0x168] sm:$0xff] }
  0x7c   :  { %2521 = vmatpush1.bf16.msra.mxu0 %v4015_v29  ;;  %v162_v42 = vld [vmem:[#allocation2 + $0x160] sm:$0xff]  ;;  %v105_v56 = vld [vmem:[%s5129_s0 + $0x8] sm:$0xff]  ;;  %v4042_v57 = vcombine.high %v159_v51, %v163_v52  ;;  %v4041_v1 = vcombine.low %v159_v51, %v163_v52 }
  0x7d   :  { %2522 = vmatprep.subr.bf16.mxu0 %v4024_v31  ;;  %v4040_v47 = vcombine.high %v158_v41, %v162_v42  ;;  %v166_v49 = vld [vmem:[#allocation2 + $0x180] sm:$0xff]  ;;  %v4039_v53 = vcombine.low %v158_v41, %v162_v42  ;;  %v5025_v60 = vpack.c.bf16 %v105_v56, %v105_v56  ;;  %v167_v61 = vld [vmem:[#allocation2 + $0x188] sm:$0xff] }
  0x7e   :  { %2683 = vmatpush1.bf16.msra.mxu1 %v4009_v30  ;;  %v170_v50 = vld [vmem:[#allocation2 + $0x1a0] sm:$0xff]  ;;  %v171_v62 = vld [vmem:[#allocation2 + $0x1a8] sm:$0xff] }
  0x7f   :  { %2684 = vmatprep.subr.bf16.mxu1 %v4018_v32  ;;  %v4048_v55 = vcombine.high %v166_v49, %v170_v50  ;;  %v174_v58 = vld [vmem:[#allocation2 + $0x1c0] sm:$0xff]  ;;  %v4047_v63 = vcombine.low %v166_v49, %v170_v50  ;;  %2548 = vmatprep.mubr.bf16.mxu0 %v5025_v60  ;;  %v4050_v3 = vcombine.high %v167_v61, %v171_v62  ;;  %v175_v6 = vld [vmem:[#allocation2 + $0x1c8] sm:$0xff] }
  0x80   :  { %2523 = vmatpush1.bf16.msra.mxu0 %v4023_v37  ;;  %v178_v59 = vld [vmem:[#allocation2 + $0x1e0] sm:$0xff]  ;;  %2712 = vmatprep.mubr.bf16.mxu1 %v5025_v60  ;;  %v179_v7 = vld [vmem:[#allocation2 + $0x1e8] sm:$0xff]  ;;  %v4049_v9 = vcombine.low %v167_v61, %v171_v62 }
  0x81   :  { %2524 = vmatprep.subr.bf16.mxu0 %v4032_v39  ;;  %v4056_v2 = vcombine.high %v174_v58, %v178_v59  ;;  %v182_v4 = vld [vmem:[#allocation2 + $0x200] sm:$0xff]  ;;  %v4055_v8 = vcombine.low %v174_v58, %v178_v59  ;;  %v4058_v11 = vcombine.high %v175_v6, %v179_v7  ;;  %v183_v14 = vld [vmem:[#allocation2 + $0x208] sm:$0xff]  ;;  %v4057_v17 = vcombine.low %v175_v6, %v179_v7 }
  0x82   :  { %2685 = vmatpush1.bf16.msra.mxu1 %v4017_v38  ;;  %v186_v5 = vld [vmem:[#allocation2 + $0x220] sm:$0xff]  ;;  %v187_v15 = vld [vmem:[#allocation2 + $0x228] sm:$0xff] }
  0x83   :  { %2686 = vmatprep.subr.bf16.mxu1 %v4026_v40  ;;  %v4064_v10 = vcombine.high %v182_v4, %v186_v5  ;;  %v190_v12 = vld [vmem:[#allocation2 + $0x240] sm:$0xff]  ;;  %v4063_v16 = vcombine.low %v182_v4, %v186_v5  ;;  %v4066_v20 = vcombine.high %v183_v14, %v187_v15  ;;  %v191_v23 = vld [vmem:[#allocation2 + $0x248] sm:$0xff]  ;;  %v4065_v26 = vcombine.low %v183_v14, %v187_v15  ;;  %v107_v15 = vld [vmem:[%s5129_s0 + $0x18] sm:$0xff] }
  0x84   :  { %2525 = vmatpush1.bf16.msra.mxu0 %v4031_v45  ;;  %v194_v13 = vld [vmem:[#allocation2 + $0x260] sm:$0xff]  ;;  %v195_v24 = vld [vmem:[#allocation2 + $0x268] sm:$0xff] }
  0x85   :  { %2526 = vmatprep.subr.bf16.mxu0 %v4040_v47  ;;  %v4072_v18 = vcombine.high %v190_v12, %v194_v13  ;;  %v198_v21 = vld [vmem:[#allocation2 + $0x280] sm:$0xff]  ;;  %v4071_v25 = vcombine.low %v190_v12, %v194_v13  ;;  %v4074_v28 = vcombine.high %v191_v23, %v195_v24  ;;  %v199_v31 = vld [vmem:[#allocation2 + $0x288] sm:$0xff]  ;;  %v4073_v34 = vcombine.low %v191_v23, %v195_v24 }
  0x86   :  { %2687 = vmatpush1.bf16.msra.mxu1 %v4025_v46  ;;  %v202_v22 = vld [vmem:[#allocation2 + $0x2a0] sm:$0xff]  ;;  %v203_v32 = vld [vmem:[#allocation2 + $0x2a8] sm:$0xff]  ;;  %v5037_v24 = vpack.c.bf16 %v107_v15, %v107_v15 }
  0x87   :  { %2688 = vmatprep.subr.bf16.mxu1 %v4034_v48  ;;  %v4080_v27 = vcombine.high %v198_v21, %v202_v22  ;;  %v206_v29 = vld [vmem:[#allocation2 + $0x2c0] sm:$0xff]  ;;  %v4079_v33 = vcombine.low %v198_v21, %v202_v22  ;;  %v4082_v36 = vcombine.high %v199_v31, %v203_v32  ;;  %v207_v39 = vld [vmem:[#allocation2 + $0x2c8] sm:$0xff]  ;;  %v4081_v42 = vcombine.low %v199_v31, %v203_v32 }
  0x88   :  { %2527 = vmatpush1.bf16.msra.mxu0 %v4039_v53  ;;  %v210_v30 = vld [vmem:[#allocation2 + $0x2e0] sm:$0xff]  ;;  %v211_v40 = vld [vmem:[#allocation2 + $0x2e8] sm:$0xff] }
  0x89   :  { %2528 = vmatprep.subr.bf16.mxu0 %v4048_v55  ;;  %v4088_v35 = vcombine.high %v206_v29, %v210_v30  ;;  %v214_v37 = vld [vmem:[#allocation2 + $0x300] sm:$0xff]  ;;  %v4087_v41 = vcombine.low %v206_v29, %v210_v30  ;;  %v4090_v44 = vcombine.high %v207_v39, %v211_v40  ;;  %v215_v47 = vld [vmem:[#allocation2 + $0x308] sm:$0xff]  ;;  %v4089_v50 = vcombine.low %v207_v39, %v211_v40 }
  0x8a   :  { %2689 = vmatpush1.bf16.msra.mxu1 %v4033_v54  ;;  %v218_v38 = vld [vmem:[#allocation2 + $0x320] sm:$0xff]  ;;  %v219_v48 = vld [vmem:[#allocation2 + $0x328] sm:$0xff] }
  0x8b   :  { %2690 = vmatprep.subr.bf16.mxu1 %v4042_v57  ;;  %v4096_v43 = vcombine.high %v214_v37, %v218_v38  ;;  %v222_v45 = vld [vmem:[#allocation2 + $0x340] sm:$0xff]  ;;  %v4095_v49 = vcombine.low %v214_v37, %v218_v38  ;;  %v4098_v52 = vcombine.high %v215_v47, %v219_v48  ;;  %v223_v55 = vld [vmem:[#allocation2 + $0x348] sm:$0xff]  ;;  %v4097_v58 = vcombine.low %v215_v47, %v219_v48 }
  0x8c   :  { %2529 = vmatpush1.bf16.msra.mxu0 %v4047_v63  ;;  %v226_v46 = vld [vmem:[#allocation2 + $0x360] sm:$0xff]  ;;  %v227_v56 = vld [vmem:[#allocation2 + $0x368] sm:$0xff] }
  0x8d   :  { %2530 = vmatprep.subr.bf16.mxu0 %v4056_v2  ;;  %v4104_v51 = vcombine.high %v222_v45, %v226_v46  ;;  %v230_v53 = vld [vmem:[#allocation2 + $0x380] sm:$0xff]  ;;  %v4103_v57 = vcombine.low %v222_v45, %v226_v46  ;;  %v4106_v61 = vcombine.high %v223_v55, %v227_v56  ;;  %v235_v2 = vld [vmem:[#allocation2 + $0x3a8] sm:$0xff]  ;;  %v4105_v4 = vcombine.low %v223_v55, %v227_v56 }
  0x8e   :  { %2691 = vmatpush1.bf16.msra.mxu1 %v4041_v1  ;;  %v234_v54 = vld [vmem:[#allocation2 + $0x3a0] sm:$0xff]  ;;  %v231_v1 = vld [vmem:[#allocation2 + $0x388] sm:$0xff] }
  0x8f   :  { %2692 = vmatprep.subr.bf16.mxu1 %v4050_v3  ;;  %v4112_v59 = vcombine.high %v230_v53, %v234_v54  ;;  %v238_v62 = vld [vmem:[#allocation2 + $0x3c0] sm:$0xff]  ;;  %v4111_v3 = vcombine.low %v230_v53, %v234_v54  ;;  %v4114_v6 = vcombine.high %v231_v1, %v235_v2  ;;  %v4113_v13 = vcombine.low %v231_v1, %v235_v2  ;;  %v247_v21 = vld [vmem:[#allocation2 + $0x408] sm:$0xff] }
  0x90   :  { %2531 = vmatpush1.bf16.msra.mxu0 %v4055_v8  ;;  %v242_v63 = vld [vmem:[#allocation2 + $0x3e0] sm:$0xff]  ;;  %v251_v22 = vld [vmem:[#allocation2 + $0x428] sm:$0xff] }
  0x91   :  { %2532 = vmatprep.subr.bf16.mxu0 %v4064_v10  ;;  %v4120_v5 = vcombine.high %v238_v62, %v242_v63  ;;  %v246_v7 = vld [vmem:[#allocation2 + $0x400] sm:$0xff]  ;;  %v243_v10 = vld [vmem:[#allocation2 + $0x3e8] sm:$0xff] }
  0x92   :  { %2693 = vmatpush1.bf16.msra.mxu1 %v4049_v9  ;;  %v250_v8 = vld [vmem:[#allocation2 + $0x420] sm:$0xff]  ;;  %v239_v9 = vld [vmem:[#allocation2 + $0x3c8] sm:$0xff] }
  0x93   :  { %2694 = vmatprep.subr.bf16.mxu1 %v4058_v11  ;;  %v4119_v11 = vcombine.low %v238_v62, %v242_v63  ;;  %v104_v12 = vld [vmem:[%s5129_s0] sm:$0xff]  ;;  %v4128_v14 = vcombine.high %v246_v7, %v250_v8  ;;  %v4127_v23 = vcombine.low %v246_v7, %v250_v8  ;;  %v255_v30 = vld [vmem:[#allocation2 + $0x448] sm:$0xff] }
  0x94   :  { %2533 = vmatpush1.bf16.msra.mxu0 %v4063_v16  ;;  %v4122_v16 = vcombine.high %v239_v9, %v243_v10  ;;  %v266_v29 = vld [vmem:[#allocation2 + $0x4a0] sm:$0xff]  ;;  %v259_v31 = vld [vmem:[#allocation2 + $0x468] sm:$0xff] }
  0x95   :  { %2534 = vmatprep.subr.bf16.mxu0 %v4072_v18  ;;  %v258_v18 = vld [vmem:[#allocation2 + $0x460] sm:$0xff]  ;;  %v263_v37 = vld [vmem:[#allocation2 + $0x488] sm:$0xff]  ;;  %v4138_v39 = vcombine.high %v255_v30, %v259_v31 }
  0x96   :  { %2695 = vmatpush1.bf16.msra.mxu1 %v4057_v17  ;;  %v254_v17 = vld [vmem:[#allocation2 + $0x440] sm:$0xff]  ;;  %v267_v38 = vld [vmem:[#allocation2 + $0x4a8] sm:$0xff] }
  0x97   :  { %2696 = vmatprep.subr.bf16.mxu1 %v4066_v20  ;;  %v5035_v20 = vpack.c.bf16 %v104_v12, %v104_v12  ;;  %v4135_v32 = vcombine.low %v254_v17, %v258_v18  ;;  %v271_v45 = vld [vmem:[#allocation2 + $0x4c8] sm:$0xff]  ;;  %v4146_v47 = vcombine.high %v263_v37, %v267_v38  ;;  %v314_v12 = vld [vmem:[#allocation2 + $0x620] sm:$0xff] }
  0x98   :  { %2535 = vmatpush1.bf16.msra.mxu0 %v4071_v25  ;;  %v4121_v25 = vcombine.low %v239_v9, %v243_v10  ;;  %v275_v46 = vld [vmem:[#allocation2 + $0x4e8] sm:$0xff] }
  0x99   :  { %2536 = vmatprep.subr.bf16.mxu0 %v4080_v27  ;;  %v4130_v27 = vcombine.high %v247_v21, %v251_v22  ;;  %v279_v53 = vld [vmem:[#allocation2 + $0x508] sm:$0xff]  ;;  %v4154_v55 = vcombine.high %v271_v45, %v275_v46 }
  0x9a   :  { %2697 = vmatpush1.bf16.msra.mxu1 %v4065_v26  ;;  %v4136_v26 = vcombine.high %v254_v17, %v258_v18  ;;  %v283_v54 = vld [vmem:[#allocation2 + $0x528] sm:$0xff] }
  0x9b   :  { %2698 = vmatprep.subr.bf16.mxu1 %v4074_v28  ;;  %v262_v28 = vld [vmem:[#allocation2 + $0x480] sm:$0xff]  ;;  %v287_v62 = vld [vmem:[#allocation2 + $0x548] sm:$0xff]  ;;  %v4162_v1 = vcombine.high %v279_v53, %v283_v54 }
  0x9c   :  { %2537 = vmatpush1.bf16.msra.mxu0 %v4079_v33  ;;  %v270_v33 = vld [vmem:[#allocation2 + $0x4c0] sm:$0xff]  ;;  %v4143_v40 = vcombine.low %v262_v28, %v266_v29  ;;  %v291_v63 = vld [vmem:[#allocation2 + $0x568] sm:$0xff] }
  0x9d   :  { %2538 = vmatprep.subr.bf16.mxu0 %v4088_v35  ;;  %v4129_v35 = vcombine.low %v247_v21, %v251_v22  ;;  %v295_v7 = vld [vmem:[#allocation2 + $0x588] sm:$0xff]  ;;  %v4170_v9 = vcombine.high %v287_v62, %v291_v63 }
  0x9e   :  { %2699 = vmatpush1.bf16.msra.mxu1 %v4073_v34  ;;  %v274_v34 = vld [vmem:[#allocation2 + $0x4e0] sm:$0xff]  ;;  %v299_v8 = vld [vmem:[#allocation2 + $0x5a8] sm:$0xff] }
  0x9f   :  { %2700 = vmatprep.subr.bf16.mxu1 %v4082_v36  ;;  %v4144_v36 = vcombine.high %v262_v28, %v266_v29  ;;  %v4151_v48 = vcombine.low %v270_v33, %v274_v34  ;;  %v303_v15 = vld [vmem:[#allocation2 + $0x5c8] sm:$0xff]  ;;  %v4178_v17 = vcombine.high %v295_v7, %v299_v8  ;;  %v4177_v21 = vcombine.low %v295_v7, %v299_v8 }
  0xa0   :  { %2539 = vmatpush1.bf16.msra.mxu0 %v4087_v41  ;;  %v278_v41 = vld [vmem:[#allocation2 + $0x500] sm:$0xff]  ;;  %v315_v28 = vld [vmem:[#allocation2 + $0x628] sm:$0xff] }
  0xa1   :  { %2540 = vmatprep.subr.bf16.mxu0 %v4096_v43  ;;  %v4137_v43 = vcombine.low %v255_v30, %v259_v31 }
  0xa2   :  { %2701 = vmatpush1.bf16.msra.mxu1 %v4081_v42  ;;  %v282_v42 = vld [vmem:[#allocation2 + $0x520] sm:$0xff] }
  0xa3   :  { %2702 = vmatprep.subr.bf16.mxu1 %v4090_v44  ;;  %v4152_v44 = vcombine.high %v270_v33, %v274_v34  ;;  %v4159_v56 = vcombine.low %v278_v41, %v282_v42  ;;  %v330_v33 = vld [vmem:[#allocation2 + $0x6a0] sm:$0xff] }
  0xa4   :  { %2541 = vmatpush1.bf16.msra.mxu0 %v4095_v49  ;;  %v286_v49 = vld [vmem:[#allocation2 + $0x540] sm:$0xff] }
  0xa5   :  { %2542 = vmatprep.subr.bf16.mxu0 %v4104_v51  ;;  %v4145_v51 = vcombine.low %v263_v37, %v267_v38 }
  0xa6   :  { %2703 = vmatpush1.bf16.msra.mxu1 %v4089_v50  ;;  %v290_v50 = vld [vmem:[#allocation2 + $0x560] sm:$0xff] }
  0xa7   :  { %2704 = vmatprep.subr.bf16.mxu1 %v4098_v52  ;;  %v4160_v52 = vcombine.high %v278_v41, %v282_v42  ;;  %v4167_v2 = vcombine.low %v286_v49, %v290_v50  ;;  %v338_v41 = vld [vmem:[#allocation2 + $0x6e0] sm:$0xff] }
  0xa8   :  { %2543 = vmatpush1.bf16.msra.mxu0 %v4103_v57  ;;  %v294_v57 = vld [vmem:[#allocation2 + $0x580] sm:$0xff] }
  0xa9   :  { %2544 = vmatprep.subr.bf16.mxu0 %v4112_v59  ;;  %v4153_v59 = vcombine.low %v271_v45, %v275_v46 }
  0xaa   :  { %2705 = vmatpush1.bf16.msra.mxu1 %v4097_v58  ;;  %v298_v58 = vld [vmem:[#allocation2 + $0x5a0] sm:$0xff] }
  0xab   :  { %2706 = vmatprep.subr.bf16.mxu1 %v4106_v61  ;;  %v4168_v61 = vcombine.high %v286_v49, %v290_v50  ;;  %v4175_v10 = vcombine.low %v294_v57, %v298_v58  ;;  %v346_v49 = vld [vmem:[#allocation2 + $0x720] sm:$0xff] }
  0xac   :  { %2545 = vmatpush1.bf16.msra.mxu0 %v4111_v3  ;;  %v302_v3 = vld [vmem:[#allocation2 + $0x5c0] sm:$0xff] }
  0xad   :  { %2546 = vmatprep.subr.bf16.mxu0 %v4120_v5  ;;  %v4161_v5 = vcombine.low %v279_v53, %v283_v54 }
  0xae   :  { %2707 = vmatpush1.bf16.msra.mxu1 %v4105_v4  ;;  %v306_v4 = vld [vmem:[#allocation2 + $0x5e0] sm:$0xff] }
  0xaf   :  { %2708 = vmatprep.subr.bf16.mxu1 %v4114_v6  ;;  %v4176_v6 = vcombine.high %v294_v57, %v298_v58  ;;  %v4183_v18 = vcombine.low %v302_v3, %v306_v4  ;;  %v354_v57 = vld [vmem:[#allocation2 + $0x760] sm:$0xff] }
  0xb0   :  { %2547 = vmatpush1.bf16.msra.mxu0 %v4119_v11  ;;  %v310_v11 = vld [vmem:[#allocation2 + $0x600] sm:$0xff] }
  0xb1   :  { %2557 = vmatprep.subr.bf16.mxu0 %v4128_v14  ;;  %v4184_v14 = vcombine.high %v302_v3, %v306_v4  ;;  %v4192_v22 = vcombine.high %v310_v11, %v314_v12  ;;  %v4191_v29 = vcombine.low %v310_v11, %v314_v12  ;;  %v362_v3 = vld [vmem:[#allocation2 + $0x7a0] sm:$0xff] }
  0xb2   :  { %2709 = vmatpush1.bf16.msra.mxu1 %v4113_v13  ;;  %v4169_v13 = vcombine.low %v287_v62, %v291_v63  ;;  %v370_v11 = vld [vmem:[#allocation2 + $0x7e0] sm:$0xff] }
  0xb3   :  { %2710 = vmatprep.subr.bf16.mxu1 %v4122_v16  ;;  %2549 = vmatmul.mubr.bf16.vlgmr.msra.gmra.mrb[0].mxu0 %v5035_v20  ;;  %v307_v16 = vld [vmem:[#allocation2 + $0x5e8] sm:$0xff] }
  0xb4   :  { %2558 = vmatpush1.bf16.msra.mxu0 %v4127_v23  ;;  %2589 = vmatprep.mubr.bf16.mxu0 %v5037_v24  ;;  %v318_v23 = vld [vmem:[#allocation2 + $0x640] sm:$0xff]  ;;  %v4185_v30 = vcombine.low %v303_v15, %v307_v16 }
  0xb5   :  { %2559 = vmatprep.subr.bf16.mxu0 %v4136_v26  ;;  %v4186_v26 = vcombine.high %v303_v15, %v307_v16  ;;  %v374_v16 = vld [vmem:[#allocation2 + $0x800] sm:$0xff] }
  0xb6   :  { %2711 = vmatpush1.bf16.msra.mxu1 %v4121_v25  ;;  %v322_v25 = vld [vmem:[#allocation2 + $0x660] sm:$0xff] }
  0xb7   :  { %2721 = vmatprep.subr.bf16.mxu1 %v4130_v27  ;;  %v311_v27 = vld [vmem:[#allocation2 + $0x608] sm:$0xff]  ;;  %v4200_v31 = vcombine.high %v318_v23, %v322_v25  ;;  %v4199_v37 = vcombine.low %v318_v23, %v322_v25 }
  0xb8   :  { %2560 = vmatpush1.bf16.msra.mxu0 %v4135_v32  ;;  %v326_v32 = vld [vmem:[#allocation2 + $0x680] sm:$0xff]  ;;  %v4194_v34 = vcombine.high %v311_v27, %v315_v28  ;;  %v4193_v38 = vcombine.low %v311_v27, %v315_v28  ;;  %v371_v25 = vld [vmem:[#allocation2 + $0x7e8] sm:$0xff] }
  0xb9   :  { %2713 = vmatmul.mubr.bf16.vlgmr.msra.gmra.mrb[4].mxu1 %v5035_v20  ;;  %2561 = vmatprep.subr.bf16.mxu0 %v4144_v36  ;;  %v323_v36 = vld [vmem:[#allocation2 + $0x668] sm:$0xff]  ;;  %v4207_v45 = vcombine.low %v326_v32, %v330_v33  ;;  %v382_v28 = vld [vmem:[#allocation2 + $0x840] sm:$0xff] }
  0xba   :  { %2722 = vmatpush1.bf16.msra.mxu1 %v4129_v35  ;;  %2753 = vmatprep.mubr.bf16.mxu1 %v5037_v24  ;;  %v319_v35 = vld [vmem:[#allocation2 + $0x648] sm:$0xff] }
  0xbb   :  { %2723 = vmatprep.subr.bf16.mxu1 %v4138_v39  ;;  %v4208_v39 = vcombine.high %v326_v32, %v330_v33  ;;  %v4202_v42 = vcombine.high %v319_v35, %v323_v36  ;;  %v4201_v46 = vcombine.low %v319_v35, %v323_v36  ;;  %v109_v32 = vld [vmem:[%s5129_s0 + $0x28] sm:$0xff] }
  0xbc   :  { %2562 = vmatpush1.bf16.msra.mxu0 %v4143_v40  ;;  %v334_v40 = vld [vmem:[#allocation2 + $0x6c0] sm:$0xff]  ;;  %v379_v35 = vld [vmem:[#allocation2 + $0x828] sm:$0xff] }
  0xbd   :  { %2563 = vmatprep.subr.bf16.mxu0 %v4152_v44  ;;  %v331_v44 = vld [vmem:[#allocation2 + $0x6a8] sm:$0xff]  ;;  %v4215_v53 = vcombine.low %v334_v40, %v338_v41 }
  0xbe   :  { %2724 = vmatpush1.bf16.msra.mxu1 %v4137_v43  ;;  %v327_v43 = vld [vmem:[#allocation2 + $0x688] sm:$0xff] }
  0xbf   :  { %2725 = vmatprep.subr.bf16.mxu1 %v4146_v47  ;;  %v4216_v47 = vcombine.high %v334_v40, %v338_v41  ;;  %v4210_v50 = vcombine.high %v327_v43, %v331_v44  ;;  %v4209_v54 = vcombine.low %v327_v43, %v331_v44  ;;  %v390_v41 = vld [vmem:[#allocation2 + $0x880] sm:$0xff]  ;;  %v383_v44 = vld [vmem:[#allocation2 + $0x848] sm:$0xff] }
  0xc0   :  { %2564 = vmatpush1.bf16.msra.mxu0 %v4151_v48  ;;  %v342_v48 = vld [vmem:[#allocation2 + $0x700] sm:$0xff] }
  0xc1   :  { %2565 = vmatprep.subr.bf16.mxu0 %v4160_v52  ;;  %v339_v52 = vld [vmem:[#allocation2 + $0x6e8] sm:$0xff]  ;;  %v4223_v62 = vcombine.low %v342_v48, %v346_v49 }
  0xc2   :  { %2726 = vmatpush1.bf16.msra.mxu1 %v4145_v51  ;;  %v335_v51 = vld [vmem:[#allocation2 + $0x6c8] sm:$0xff] }
  0xc3   :  { %2727 = vmatprep.subr.bf16.mxu1 %v4154_v55  ;;  %v4224_v55 = vcombine.high %v342_v48, %v346_v49  ;;  %v4218_v58 = vcombine.high %v335_v51, %v339_v52  ;;  %v4217_v63 = vcombine.low %v335_v51, %v339_v52  ;;  %v398_v49 = vld [vmem:[#allocation2 + $0x8c0] sm:$0xff]  ;;  %v391_v52 = vld [vmem:[#allocation2 + $0x888] sm:$0xff] }
  0xc4   :  { %2566 = vmatpush1.bf16.msra.mxu0 %v4159_v56  ;;  %v350_v56 = vld [vmem:[#allocation2 + $0x740] sm:$0xff] }
  0xc5   :  { %2567 = vmatprep.subr.bf16.mxu0 %v4168_v61  ;;  %v347_v61 = vld [vmem:[#allocation2 + $0x728] sm:$0xff]  ;;  %v4231_v7 = vcombine.low %v350_v56, %v354_v57 }
  0xc6   :  { %2728 = vmatpush1.bf16.msra.mxu1 %v4153_v59  ;;  %v343_v59 = vld [vmem:[#allocation2 + $0x708] sm:$0xff] }
  0xc7   :  { %2729 = vmatprep.subr.bf16.mxu1 %v4162_v1  ;;  %v4232_v1 = vcombine.high %v350_v56, %v354_v57  ;;  %v4226_v4 = vcombine.high %v343_v59, %v347_v61  ;;  %v4225_v8 = vcombine.low %v343_v59, %v347_v61  ;;  %v410_v59 = vld [vmem:[#allocation2 + $0x920] sm:$0xff]  ;;  %v399_v61 = vld [vmem:[#allocation2 + $0x8c8] sm:$0xff] }
  0xc8   :  { %2568 = vmatpush1.bf16.msra.mxu0 %v4167_v2  ;;  %v358_v2 = vld [vmem:[#allocation2 + $0x780] sm:$0xff] }
  0xc9   :  { %2569 = vmatprep.subr.bf16.mxu0 %v4176_v6  ;;  %v355_v6 = vld [vmem:[#allocation2 + $0x768] sm:$0xff]  ;;  %v4239_v15 = vcombine.low %v358_v2, %v362_v3 }
  0xca   :  { %2730 = vmatpush1.bf16.msra.mxu1 %v4161_v5  ;;  %v351_v5 = vld [vmem:[#allocation2 + $0x748] sm:$0xff] }
  0xcb   :  { %2731 = vmatprep.subr.bf16.mxu1 %v4170_v9  ;;  %v4240_v9 = vcombine.high %v358_v2, %v362_v3  ;;  %v4234_v12 = vcombine.high %v351_v5, %v355_v6 }
  0xcc   :  { %2570 = vmatpush1.bf16.msra.mxu0 %v4175_v10  ;;  %v366_v10 = vld [vmem:[#allocation2 + $0x7c0] sm:$0xff] }
  0xcd   :  { %2571 = vmatprep.subr.bf16.mxu0 %v4184_v14  ;;  %v363_v14 = vld [vmem:[#allocation2 + $0x7a8] sm:$0xff]  ;;  %v4247_v27 = vcombine.low %v366_v10, %v370_v11 }
  0xce   :  { %2732 = vmatpush1.bf16.msra.mxu1 %v4169_v13  ;;  %v359_v13 = vld [vmem:[#allocation2 + $0x788] sm:$0xff] }
  0xcf   :  { %2733 = vmatprep.subr.bf16.mxu1 %v4178_v17  ;;  %v4233_v17 = vcombine.low %v351_v5, %v355_v6  ;;  %v4242_v23 = vcombine.high %v359_v13, %v363_v14  ;;  %v418_v5 = vld [vmem:[#allocation2 + $0x960] sm:$0xff]  ;;  %v407_v6 = vld [vmem:[#allocation2 + $0x908] sm:$0xff] }
  0xd0   :  { %2572 = vmatpush1.bf16.msra.mxu0 %v4183_v18  ;;  %v4248_v18 = vcombine.high %v366_v10, %v370_v11 }
  0xd1   :  { %2573 = vmatprep.subr.bf16.mxu0 %v4192_v22  ;;  %v367_v22 = vld [vmem:[#allocation2 + $0x7c8] sm:$0xff] }
  0xd2   :  { %2734 = vmatpush1.bf16.msra.mxu1 %v4177_v21  ;;  %v378_v21 = vld [vmem:[#allocation2 + $0x820] sm:$0xff]  ;;  %v4250_v33 = vcombine.high %v367_v22, %v371_v25 }
  0xd3   :  { %2735 = vmatprep.subr.bf16.mxu1 %v4186_v26  ;;  %v106_v26 = vld [vmem:[%s5129_s0 + $0x10] sm:$0xff] }
  0xd4   :  { %2574 = vmatpush1.bf16.msra.mxu0 %v4191_v29  ;;  %v4241_v29 = vcombine.low %v359_v13, %v363_v14  ;;  %v5049_v36 = vpack.c.bf16 %v106_v26, %v106_v26  ;;  %v426_v13 = vld [vmem:[#allocation2 + $0x9a0] sm:$0xff]  ;;  %v415_v14 = vld [vmem:[#allocation2 + $0x948] sm:$0xff] }
  0xd5   :  { %2575 = vmatprep.subr.bf16.mxu0 %v4200_v31  ;;  %v386_v31 = vld [vmem:[#allocation2 + $0x860] sm:$0xff]  ;;  %v427_v26 = vld [vmem:[#allocation2 + $0x9a8] sm:$0xff] }
  0xd6   :  { %2736 = vmatpush1.bf16.msra.mxu1 %v4185_v30  ;;  %v4256_v30 = vcombine.high %v374_v16, %v378_v21  ;;  %v4264_v40 = vcombine.high %v382_v28, %v386_v31 }
  0xd7   :  { %2737 = vmatprep.subr.bf16.mxu1 %v4194_v34  ;;  %v375_v34 = vld [vmem:[#allocation2 + $0x808] sm:$0xff] }
  0xd8   :  { %2576 = vmatpush1.bf16.msra.mxu0 %v4199_v37  ;;  %v4255_v37 = vcombine.low %v374_v16, %v378_v21  ;;  %v4258_v43 = vcombine.high %v375_v34, %v379_v35 }
  0xd9   :  { %2577 = vmatprep.subr.bf16.mxu0 %v4208_v39  ;;  %v4249_v39 = vcombine.low %v367_v22, %v371_v25  ;;  %v430_v22 = vld [vmem:[#allocation2 + $0x9c0] sm:$0xff]  ;;  %v423_v25 = vld [vmem:[#allocation2 + $0x988] sm:$0xff] }
  0xda   :  { %2738 = vmatpush1.bf16.msra.mxu1 %v4193_v38  ;;  %v5051_v38 = vpack.c.bf16 %v109_v32, %v109_v32  ;;  %v442_v32 = vld [vmem:[#allocation2 + $0xa20] sm:$0xff] }
  0xdb   :  { %2739 = vmatprep.subr.bf16.mxu1 %v4202_v42  ;;  %v394_v42 = vld [vmem:[#allocation2 + $0x8a0] sm:$0xff] }
  0xdc   :  { %2578 = vmatpush1.bf16.msra.mxu0 %v4207_v45  ;;  %v387_v45 = vld [vmem:[#allocation2 + $0x868] sm:$0xff]  ;;  %v4272_v48 = vcombine.high %v390_v41, %v394_v42 }
  0xdd   :  { %2579 = vmatprep.subr.bf16.mxu0 %v4216_v47  ;;  %v4257_v47 = vcombine.low %v375_v34, %v379_v35  ;;  %v4266_v51 = vcombine.high %v383_v44, %v387_v45  ;;  %v435_v34 = vld [vmem:[#allocation2 + $0x9e8] sm:$0xff] }
  0xde   :  { %2740 = vmatpush1.bf16.msra.mxu1 %v4201_v46  ;;  %v4263_v46 = vcombine.low %v382_v28, %v386_v31  ;;  %v438_v31 = vld [vmem:[#allocation2 + $0xa00] sm:$0xff] }
  0xdf   :  { %2741 = vmatprep.subr.bf16.mxu1 %v4210_v50  ;;  %v402_v50 = vld [vmem:[#allocation2 + $0x8e0] sm:$0xff] }
  0xe0   :  { %2580 = vmatpush1.bf16.msra.mxu0 %v4215_v53  ;;  %v395_v53 = vld [vmem:[#allocation2 + $0x8a8] sm:$0xff]  ;;  %v4280_v56 = vcombine.high %v398_v49, %v402_v50 }
  0xe1   :  { %2581 = vmatprep.subr.bf16.mxu0 %v4224_v55  ;;  %v4265_v55 = vcombine.low %v383_v44, %v387_v45  ;;  %v4274_v57 = vcombine.high %v391_v52, %v395_v53  ;;  %v443_v44 = vld [vmem:[#allocation2 + $0xa28] sm:$0xff]  ;;  %v4319_v45 = vcombine.low %v438_v31, %v442_v32 }
  0xe2   :  { %2742 = vmatpush1.bf16.msra.mxu1 %v4209_v54  ;;  %v4271_v54 = vcombine.low %v390_v41, %v394_v42  ;;  %v446_v41 = vld [vmem:[#allocation2 + $0xa40] sm:$0xff] }
  0xe3   :  { %2743 = vmatprep.subr.bf16.mxu1 %v4218_v58  ;;  %v406_v58 = vld [vmem:[#allocation2 + $0x900] sm:$0xff] }
  0xe4   :  { %2582 = vmatpush1.bf16.msra.mxu0 %v4223_v62  ;;  %v403_v62 = vld [vmem:[#allocation2 + $0x8e8] sm:$0xff]  ;;  %v4288_v2 = vcombine.high %v406_v58, %v410_v59  ;;  %v450_v42 = vld [vmem:[#allocation2 + $0xa60] sm:$0xff] }
  0xe5   :  { %2583 = vmatprep.subr.bf16.mxu0 %v4232_v1  ;;  %v4273_v1 = vcombine.low %v391_v52, %v395_v53  ;;  %v4282_v3 = vcombine.high %v399_v61, %v403_v62  ;;  %v451_v52 = vld [vmem:[#allocation2 + $0xa68] sm:$0xff]  ;;  %v4327_v53 = vcombine.low %v446_v41, %v450_v42 }
  0xe6   :  { %2744 = vmatpush1.bf16.msra.mxu1 %v4217_v63  ;;  %v4279_v63 = vcombine.low %v398_v49, %v402_v50  ;;  %v454_v49 = vld [vmem:[#allocation2 + $0xa80] sm:$0xff] }
  0xe7   :  { %2745 = vmatprep.subr.bf16.mxu1 %v4226_v4  ;;  %v414_v4 = vld [vmem:[#allocation2 + $0x940] sm:$0xff] }
  0xe8   :  { %2584 = vmatpush1.bf16.msra.mxu0 %v4231_v7  ;;  %v411_v7 = vld [vmem:[#allocation2 + $0x928] sm:$0xff]  ;;  %v4296_v10 = vcombine.high %v414_v4, %v418_v5  ;;  %v4295_v16 = vcombine.low %v414_v4, %v418_v5  ;;  %v458_v50 = vld [vmem:[#allocation2 + $0xaa0] sm:$0xff] }
  0xe9   :  { %2585 = vmatprep.subr.bf16.mxu0 %v4240_v9  ;;  %v4281_v9 = vcombine.low %v399_v61, %v403_v62  ;;  %v4290_v11 = vcombine.high %v407_v6, %v411_v7  ;;  %v459_v61 = vld [vmem:[#allocation2 + $0xaa8] sm:$0xff]  ;;  %v4335_v62 = vcombine.low %v454_v49, %v458_v50  ;;  %v474_v4 = vld [vmem:[#allocation2 + $0xb20] sm:$0xff] }
  0xea   :  { %2746 = vmatpush1.bf16.msra.mxu1 %v4225_v8  ;;  %v4287_v8 = vcombine.low %v406_v58, %v410_v59  ;;  %v466_v58 = vld [vmem:[#allocation2 + $0xae0] sm:$0xff]  ;;  %v455_v59 = vld [vmem:[#allocation2 + $0xa88] sm:$0xff] }
  0xeb   :  { %2747 = vmatprep.subr.bf16.mxu1 %v4234_v12  ;;  %v422_v12 = vld [vmem:[#allocation2 + $0x980] sm:$0xff]  ;;  %v463_v5 = vld [vmem:[#allocation2 + $0xac8] sm:$0xff] }
  0xec   :  { %2586 = vmatpush1.bf16.msra.mxu0 %v4239_v15  ;;  %v419_v15 = vld [vmem:[#allocation2 + $0x968] sm:$0xff] }
  0xed   :  { %2587 = vmatprep.subr.bf16.mxu0 %v4248_v18  ;;  %v4304_v18 = vcombine.high %v422_v12, %v426_v13  ;;  %v4298_v21 = vcombine.high %v415_v14, %v419_v15  ;;  %v4297_v28 = vcombine.low %v415_v14, %v419_v15  ;;  %v475_v14 = vld [vmem:[#allocation2 + $0xb28] sm:$0xff] }
  0xee   :  { %2748 = vmatpush1.bf16.msra.mxu1 %v4233_v17  ;;  %v4289_v17 = vcombine.low %v407_v6, %v411_v7  ;;  %v467_v6 = vld [vmem:[#allocation2 + $0xae8] sm:$0xff] }
  0xef   :  { %2749 = vmatprep.subr.bf16.mxu1 %v4242_v23  ;;  %v434_v23 = vld [vmem:[#allocation2 + $0x9e0] sm:$0xff] }
  0xf0   :  { %2588 = vmatpush1.bf16.msra.mxu0 %v4247_v27  ;;  %v4303_v27 = vcombine.low %v422_v12, %v426_v13  ;;  %v4311_v35 = vcombine.low %v430_v22, %v434_v23  ;;  %v482_v12 = vld [vmem:[#allocation2 + $0xb60] sm:$0xff]  ;;  %v471_v13 = vld [vmem:[#allocation2 + $0xb08] sm:$0xff] }
  0xf1   :  { %2598 = vmatprep.subr.bf16.mxu0 %v4256_v30  ;;  %v4306_v30 = vcombine.high %v423_v25, %v427_v26 }
  0xf2   :  { %2750 = vmatpush1.bf16.msra.mxu1 %v4241_v29  ;;  %v4312_v29 = vcombine.high %v430_v22, %v434_v23  ;;  %v490_v22 = vld [vmem:[#allocation2 + $0xba0] sm:$0xff]  ;;  %v479_v23 = vld [vmem:[#allocation2 + $0xb48] sm:$0xff] }
  0xf3   :  { %2751 = vmatprep.subr.bf16.mxu1 %v4250_v33  ;;  %2590 = vmatmul.mubr.bf16.vlgmr.msra.gmra.mrb[0].mxu0 %v5049_v36  ;;  %v431_v33 = vld [vmem:[#allocation2 + $0x9c8] sm:$0xff] }
  0xf4   :  { %2599 = vmatpush1.bf16.msra.mxu0 %v4255_v37  ;;  %2630 = vmatprep.mubr.bf16.mxu0 %v5051_v38  ;;  %v4305_v37 = vcombine.low %v423_v25, %v427_v26  ;;  %v483_v25 = vld [vmem:[#allocation2 + $0xb68] sm:$0xff] }
  0xf5   :  { %2600 = vmatprep.subr.bf16.mxu0 %v4264_v40  ;;  %v4314_v40 = vcombine.high %v431_v33, %v435_v34 }
  0xf6   :  { %2752 = vmatpush1.bf16.msra.mxu1 %v4249_v39  ;;  %v4320_v39 = vcombine.high %v438_v31, %v442_v32  ;;  %v498_v31 = vld [vmem:[#allocation2 + $0xbe0] sm:$0xff]  ;;  %v487_v32 = vld [vmem:[#allocation2 + $0xb88] sm:$0xff] }
  0xf7   :  { %2762 = vmatprep.subr.bf16.mxu1 %v4258_v43  ;;  %v439_v43 = vld [vmem:[#allocation2 + $0xa08] sm:$0xff] }
  0xf8   :  { %2601 = vmatpush1.bf16.msra.mxu0 %v4263_v46  ;;  %v4313_v46 = vcombine.low %v431_v33, %v435_v34  ;;  %v491_v33 = vld [vmem:[#allocation2 + $0xba8] sm:$0xff] }
  0xf9   :  { %2754 = vmatmul.mubr.bf16.vlgmr.msra.gmra.mrb[4].mxu1 %v5049_v36  ;;  %2602 = vmatprep.subr.bf16.mxu0 %v4272_v48  ;;  %v4322_v48 = vcombine.high %v439_v43, %v443_v44 }
  0xfa   :  { %2763 = vmatpush1.bf16.msra.mxu1 %v4257_v47  ;;  %2794 = vmatprep.mubr.bf16.mxu1 %v5051_v38  ;;  %v4328_v47 = vcombine.high %v446_v41, %v450_v42  ;;  %v124_v41 = vld [vmem:[#allocation2 + $0x30] sm:$0xff]  ;;  %v495_v42 = vld [vmem:[#allocation2 + $0xbc8] sm:$0xff] }
  0xfb   :  { %2764 = vmatprep.subr.bf16.mxu1 %v4266_v51  ;;  %v447_v51 = vld [vmem:[#allocation2 + $0xa48] sm:$0xff] }
  0xfc   :  { %2603 = vmatpush1.bf16.msra.mxu0 %v4271_v54  ;;  %v4321_v54 = vcombine.low %v439_v43, %v443_v44  ;;  %v499_v43 = vld [vmem:[#allocation2 + $0xbe8] sm:$0xff] }
  0xfd   :  { %2604 = vmatprep.subr.bf16.mxu0 %v4280_v56  ;;  %v4330_v56 = vcombine.high %v447_v51, %v451_v52 }
  0xfe   :  { %2765 = vmatpush1.bf16.msra.mxu1 %v4265_v55  ;;  %v4336_v55 = vcombine.high %v454_v49, %v458_v50  ;;  %v128_v49 = vld [vmem:[#allocation2 + $0x50] sm:$0xff] }
  0xff   :  { %2766 = vmatprep.subr.bf16.mxu1 %v4274_v57  ;;  %v462_v57 = vld [vmem:[#allocation2 + $0xac0] sm:$0xff]  ;;  %v132_v50 = vld [vmem:[#allocation2 + $0x70] sm:$0xff] }
 0x100   :  { %2605 = vmatpush1.bf16.msra.mxu0 %v4279_v63  ;;  %v4329_v63 = vcombine.low %v447_v51, %v451_v52  ;;  %v4343_v7 = vcombine.low %v462_v57, %v466_v58  ;;  %v503_v52 = vld [vmem:[#allocation2 + $0xc08] sm:$0xff] }
 0x101   :  { %2606 = vmatprep.subr.bf16.mxu0 %v4288_v2  ;;  %v4338_v2 = vcombine.high %v455_v59, %v459_v61 }
 0x102   :  { %2767 = vmatpush1.bf16.msra.mxu1 %v4273_v1  ;;  %v4344_v1 = vcombine.high %v462_v57, %v466_v58  ;;  %v136_v58 = vld [vmem:[#allocation2 + $0x90] sm:$0xff] }
 0x103   :  { %2768 = vmatprep.subr.bf16.mxu1 %v4282_v3  ;;  %v470_v3 = vld [vmem:[#allocation2 + $0xb00] sm:$0xff] }
 0x104   :  { %2607 = vmatpush1.bf16.msra.mxu0 %v4287_v8  ;;  %v4337_v8 = vcombine.low %v455_v59, %v459_v61  ;;  %v4351_v15 = vcombine.low %v470_v3, %v474_v4  ;;  %v140_v59 = vld [vmem:[#allocation2 + $0xb0] sm:$0xff] }
 0x105   :  { %2608 = vmatprep.subr.bf16.mxu0 %v4296_v10  ;;  %v4346_v10 = vcombine.high %v463_v5, %v467_v6  ;;  %v504_v61 = vld [vmem:[#allocation2 + $0xc10] sm:$0xff] }
 0x106   :  { %2769 = vmatpush1.bf16.msra.mxu1 %v4281_v9  ;;  %v4352_v9 = vcombine.high %v470_v3, %v474_v4  ;;  %v144_v3 = vld [vmem:[#allocation2 + $0xd0] sm:$0xff] }
 0x107   :  { %2770 = vmatprep.subr.bf16.mxu1 %v4290_v11  ;;  %v478_v11 = vld [vmem:[#allocation2 + $0xb40] sm:$0xff]  ;;  %v148_v4 = vld [vmem:[#allocation2 + $0xf0] sm:$0xff] }
 0x108   :  { %2609 = vmatpush1.bf16.msra.mxu0 %v4295_v16  ;;  %v4345_v16 = vcombine.low %v463_v5, %v467_v6  ;;  %v4359_v26 = vcombine.low %v478_v11, %v482_v12  ;;  %v4019_v6 = vcombine.low %v136_v58, %v140_v59 }
 0x109   :  { %2610 = vmatprep.subr.bf16.mxu0 %v4304_v18  ;;  %v4354_v18 = vcombine.high %v471_v13, %v475_v14 }
 0x10a   :  { %2771 = vmatpush1.bf16.msra.mxu1 %v4289_v17  ;;  %v4360_v17 = vcombine.high %v478_v11, %v482_v12  ;;  %v160_v12 = vld [vmem:[#allocation2 + $0x150] sm:$0xff] }
 0x10b   :  { %2772 = vmatprep.subr.bf16.mxu1 %v4298_v21  ;;  %v486_v21 = vld [vmem:[#allocation2 + $0xb80] sm:$0xff] }
 0x10c   :  { %2611 = vmatpush1.bf16.msra.mxu0 %v4303_v27  ;;  %v4353_v27 = vcombine.low %v471_v13, %v475_v14  ;;  %v4367_v34 = vcombine.low %v486_v21, %v490_v22  ;;  %v164_v13 = vld [vmem:[#allocation2 + $0x170] sm:$0xff]  ;;  %v121_v14 = vld [vmem:[#allocation2 + $0x18] sm:$0xff] }
 0x10d   :  { %2612 = vmatprep.subr.bf16.mxu0 %v4312_v29  ;;  %v4362_v29 = vcombine.high %v479_v23, %v483_v25 }
 0x10e   :  { %2773 = vmatpush1.bf16.msra.mxu1 %v4297_v28  ;;  %v4368_v28 = vcombine.high %v486_v21, %v490_v22  ;;  %v168_v22 = vld [vmem:[#allocation2 + $0x190] sm:$0xff] }
 0x10f   :  { %2774 = vmatprep.subr.bf16.mxu1 %v4306_v30  ;;  %v494_v30 = vld [vmem:[#allocation2 + $0xbc0] sm:$0xff] }
 0x110   :  { %2613 = vmatpush1.bf16.msra.mxu0 %v4311_v35  ;;  %v4361_v35 = vcombine.low %v479_v23, %v483_v25  ;;  %v4375_v44 = vcombine.low %v494_v30, %v498_v31  ;;  %v172_v23 = vld [vmem:[#allocation2 + $0x1b0] sm:$0xff]  ;;  %v4043_v25 = vcombine.low %v160_v12, %v164_v13 }
 0x111   :  { %2614 = vmatprep.subr.bf16.mxu0 %v4320_v39  ;;  %v4370_v39 = vcombine.high %v487_v32, %v491_v33 }
 0x112   :  { %2775 = vmatpush1.bf16.msra.mxu1 %v4305_v37  ;;  %v4376_v37 = vcombine.high %v494_v30, %v498_v31  ;;  %v133_v30 = vld [vmem:[#allocation2 + $0x78] sm:$0xff]  ;;  %v4051_v31 = vcombine.low %v168_v22, %v172_v23 }
 0x113   :  { %2776 = vmatprep.subr.bf16.mxu1 %v4314_v40  ;;  %v120_v40 = vld [vmem:[#allocation2 + $0x10] sm:$0xff] }
 0x114   :  { %2615 = vmatpush1.bf16.msra.mxu0 %v4319_v45  ;;  %v108_v45 = vld [vmem:[%s5129_s0 + $0x20] sm:$0xff]  ;;  %s4901_s0 = smov [#allocation13]  }
 0x115   :  { %2616 = vmatprep.subr.bf16.mxu0 %v4328_v47  ;;  %v4004_v47 = vcombine.high %v120_v40, %v124_v41  ;;  %v5060_v51 = vpack.c.bf16 %v108_v45, %v108_v45  ;;  %s3987_s13 = sshll.u32 %s4901_s0, 4  ;;  %s3988_s13 = int_to_ptr.vmem [resolvable:$true] %s3987_s13 }
 0x116   :  { %2777 = vmatpush1.bf16.msra.mxu1 %v4313_v46  ;;  %v4369_v46 = vcombine.low %v487_v32, %v491_v33  ;;  %s4856_s3 = scalar_lea.vmem %s3988_s13, 128  ;;  %p4861_p7 = scmp.lt.s32.totalorder %s3988_s13, %s3988_s13 }
 0x117   :  { %2778 = vmatprep.subr.bf16.mxu1 %v4322_v48  ;;  %v4378_v48 = vcombine.high %v495_v42, %v499_v43  ;;  %p4857_p6 = scmp.ne.s32.totalorder %s3988_s13, %s4856_s3  ;;  %p4862_p8 = scmp.lt.s32.totalorder %s4856_s3, %s4856_s3 }
 0x118   :  { %2617 = vmatpush1.bf16.msra.mxu0 %v4327_v53  ;;  %v507_v53 = vld [vmem:[#allocation2 + $0xc28] sm:$0xff] }
 0x119   :  { %2618 = vmatprep.subr.bf16.mxu0 %v4336_v55  ;;  %v4377_v55 = vcombine.low %v495_v42, %v499_v43  ;;  %v4386_v57 = vcombine.high %v503_v52, %v507_v53  ;;  %p4863_p9 = por %p4862_p8, %p4861_p7 }
 0x11a   :  { %2779 = vmatpush1.bf16.msra.mxu1 %v4321_v54  ;;  %v4003_v54 = vcombine.low %v120_v40, %v124_v41  ;;  %v137_v40 = vld [vmem:[#allocation2 + $0x98] sm:$0xff] }
 0x11b   :  { %2780 = vmatprep.subr.bf16.mxu1 %v4330_v56  ;;  %v4012_v56 = vcombine.high %v128_v49, %v132_v50  ;;  %v141_v41 = vld [vmem:[#allocation2 + $0xb8] sm:$0xff]  ;;  %p4864_p10 = pnand %p4863_p9, %p4857_p6 }
 0x11c   :  { %2619 = vmatpush1.bf16.msra.mxu0 %v4335_v62  ;;  %v508_v62 = vld [vmem:[#allocation2 + $0xc30] sm:$0xff] }
 0x11d   :  { %2620 = vmatprep.subr.bf16.mxu0 %v4344_v1  ;;  %v4385_v1 = vcombine.low %v503_v52, %v507_v53  ;;  %v4388_v5 = vcombine.high %v504_v61, %v508_v62  ;;  %v145_v52 = vld [vmem:[#allocation2 + $0xd8] sm:$0xff] }
 0x11e   :  { %2781 = vmatpush1.bf16.msra.mxu1 %v4329_v63  ;;  %v4011_v63 = vcombine.low %v128_v49, %v132_v50  ;;  %v192_v49 = vld [vmem:[#allocation2 + $0x250] sm:$0xff]  ;;  %v149_v53 = vld [vmem:[#allocation2 + $0xf8] sm:$0xff] }
 0x11f   :  { %2782 = vmatprep.subr.bf16.mxu1 %v4338_v2  ;;  %v4020_v2 = vcombine.high %v136_v58, %v140_v59  ;;  %v196_v50 = vld [vmem:[#allocation2 + $0x270] sm:$0xff] }
 0x120   :  { %2621 = vmatpush1.bf16.msra.mxu0 %v4343_v7  ;;  %v4028_v7 = vcombine.high %v144_v3, %v148_v4  ;;  %v200_v58 = vld [vmem:[#allocation2 + $0x290] sm:$0xff] }
 0x121   :  { %2622 = vmatprep.subr.bf16.mxu0 %v4352_v9  ;;  %v156_v9 = vld [vmem:[#allocation2 + $0x130] sm:$0xff] }
 0x122   :  { %2783 = vmatpush1.bf16.msra.mxu1 %v4337_v8  ;;  %v152_v8 = vld [vmem:[#allocation2 + $0x110] sm:$0xff] }
 0x123   :  { %2784 = vmatprep.subr.bf16.mxu1 %v4346_v10  ;;  %v4027_v10 = vcombine.low %v144_v3, %v148_v4  ;;  %v4036_v11 = vcombine.high %v152_v8, %v156_v9  ;;  %v204_v59 = vld [vmem:[#allocation2 + $0x2b0] sm:$0xff] }
 0x124   :  { %2623 = vmatpush1.bf16.msra.mxu0 %v4351_v15  ;;  %v125_v15 = vld [vmem:[#allocation2 + $0x38] sm:$0xff]  ;;  %v208_v3 = vld [vmem:[#allocation2 + $0x2d0] sm:$0xff] }
 0x125   :  { %2624 = vmatprep.subr.bf16.mxu0 %v4360_v17  ;;  %v4387_v17 = vcombine.low %v504_v61, %v508_v62  ;;  %v4006_v21 = vcombine.high %v121_v14, %v125_v15  ;;  %v4005_v32 = vcombine.low %v121_v14, %v125_v15  ;;  %v153_v61 = vld [vmem:[#allocation2 + $0x118] sm:$0xff]  ;;  %v212_v4 = vld [vmem:[#allocation2 + $0x2f0] sm:$0xff] }
 0x126   :  { %2785 = vmatpush1.bf16.msra.mxu1 %v4345_v16  ;;  %v4035_v16 = vcombine.low %v152_v8, %v156_v9  ;;  %v157_v62 = vld [vmem:[#allocation2 + $0x138] sm:$0xff]  ;;  %v4092_v9 = vcombine.high %v208_v3, %v212_v4  ;;  %v4091_v15 = vcombine.low %v208_v3, %v212_v4  ;;  %v264_v4 = vld [vmem:[#allocation2 + $0x490] sm:$0xff] }
 0x127   :  { %2786 = vmatprep.subr.bf16.mxu1 %v4354_v18  ;;  %v4044_v18 = vcombine.high %v160_v12, %v164_v13  ;;  %v4037_v8 = vcombine.low %v153_v61, %v157_v62  ;;  %v220_v12 = vld [vmem:[#allocation2 + $0x330] sm:$0xff]  ;;  %v169_v13 = vld [vmem:[#allocation2 + $0x198] sm:$0xff] }
 0x128   :  { %2625 = vmatpush1.bf16.msra.mxu0 %v4359_v26  ;;  %v4052_v26 = vcombine.high %v168_v22, %v172_v23  ;;  %v173_v14 = vld [vmem:[#allocation2 + $0x1b8] sm:$0xff]  ;;  %v228_v22 = vld [vmem:[#allocation2 + $0x370] sm:$0xff] }
 0x129   :  { %2626 = vmatprep.subr.bf16.mxu0 %v4368_v28  ;;  %v180_v28 = vld [vmem:[#allocation2 + $0x1f0] sm:$0xff]  ;;  %v177_v23 = vld [vmem:[#allocation2 + $0x1d8] sm:$0xff] }
 0x12a   :  { %2787 = vmatpush1.bf16.msra.mxu1 %v4353_v27  ;;  %v176_v27 = vld [vmem:[#allocation2 + $0x1d0] sm:$0xff] }
 0x12b   :  { %2788 = vmatprep.subr.bf16.mxu1 %v4362_v29  ;;  %v129_v29 = vld [vmem:[#allocation2 + $0x58] sm:$0xff]  ;;  %v4060_v33 = vcombine.high %v176_v27, %v180_v28  ;;  %v4059_v43 = vcombine.low %v176_v27, %v180_v28  ;;  %v4053_v27 = vcombine.low %v169_v13, %v173_v14 }
 0x12c   :  { %2627 = vmatpush1.bf16.msra.mxu0 %v4367_v34  ;;  %v4014_v34 = vcombine.high %v129_v29, %v133_v30  ;;  %v4013_v45 = vcombine.low %v129_v29, %v133_v30  ;;  %v232_v30 = vld [vmem:[#allocation2 + $0x390] sm:$0xff] }
 0x12d   :  { %2628 = vmatprep.subr.bf16.mxu0 %v4376_v37  ;;  %v188_v37 = vld [vmem:[#allocation2 + $0x230] sm:$0xff] }
 0x12e   :  { %2789 = vmatpush1.bf16.msra.mxu1 %v4361_v35  ;;  %v184_v35 = vld [vmem:[#allocation2 + $0x210] sm:$0xff] }
 0x12f   :  { %2790 = vmatprep.subr.bf16.mxu1 %v4370_v39 }
 0x130   :  { %2629 = vmatpush1.bf16.msra.mxu0 %v4375_v44 }
 0x131   :  { %2844 = vmatprep.subr.bf16.mxu0 %v4004_v47 }
 0x132   :  { %2791 = vmatpush1.bf16.msra.mxu1 %v4369_v46  ;;  %v4068_v46 = vcombine.high %v184_v35, %v188_v37 }
 0x133   :  { %2792 = vmatprep.subr.bf16.mxu1 %v4378_v48  ;;  %2631 = vmatmul.mubr.bf16.vlgmr.msra.gmra.mrb[0].mxu0 %v5060_v51  ;;  %v4022_v48 = vcombine.high %v137_v40, %v141_v41 }
 0x134   :  { %2845 = vmatpush1.bf16.msra.mxu0 %v4003_v54  ;;  %2876 = vmatprep.mubr.bf16.mxu0 %v5025_v60  ;;  %v4067_v54 = vcombine.low %v184_v35, %v188_v37 }
 0x135   :  { %2846 = vmatprep.subr.bf16.mxu0 %v4012_v56  ;;  %v4076_v56 = vcombine.high %v192_v49, %v196_v50 }
 0x136   :  { %2793 = vmatpush1.bf16.msra.mxu1 %v4377_v55  ;;  %v4021_v55 = vcombine.low %v137_v40, %v141_v41  ;;  %v240_v41 = vld [vmem:[#allocation2 + $0x3d0] sm:$0xff] }
 0x137   :  { %2803 = vmatprep.subr.bf16.mxu1 %v4386_v57  ;;  %v4030_v57 = vcombine.high %v145_v52, %v149_v53 }
 0x138   :  { %2847 = vmatpush1.bf16.msra.mxu0 %v4011_v63  ;;  %v4075_v63 = vcombine.low %v192_v49, %v196_v50  ;;  %v248_v50 = vld [vmem:[#allocation2 + $0x410] sm:$0xff] }
 0x139   :  { %2795 = vmatmul.mubr.bf16.vlgmr.msra.gmra.mrb[4].mxu1 %v5060_v51  ;;  %2848 = vmatprep.subr.bf16.mxu0 %v4020_v2  ;;  %v4038_v2 = vcombine.high %v153_v61, %v157_v62  ;;  %v260_v61 = vld [vmem:[#allocation2 + $0x470] sm:$0xff]  ;;  %v209_v62 = vld [vmem:[#allocation2 + $0x2d8] sm:$0xff] }
 0x13a   :  { %2804 = vmatpush1.bf16.msra.mxu1 %v4385_v1  ;;  %2835 = vmatprep.mubr.bf16.mxu1 %v4898_v0  ;;  %v4029_v1 = vcombine.low %v145_v52, %v149_v53  ;;  %v252_v52 = vld [vmem:[#allocation2 + $0x430] sm:$0xff]  ;;  %v201_v53 = vld [vmem:[#allocation2 + $0x298] sm:$0xff] }
 0x13b   :  { %2967 = vmatprep.subr.bf16.mxu1 %v4388_v5  ;;  %v161_v5 = vld [vmem:[#allocation2 + $0x158] sm:$0xff] }
 0x13c   :  { %2849 = vmatpush1.bf16.msra.mxu0 %v4019_v6  ;;  %v165_v6 = vld [vmem:[#allocation2 + $0x178] sm:$0xff] }
 0x13d   :  { %2850 = vmatprep.subr.bf16.mxu0 %v4028_v7  ;;  %v4083_v7 = vcombine.low %v200_v58, %v204_v59 }
 0x140   :  { %2851 = vmatpush1.bf16.msra.mxu0 %v4027_v10  ;;  %v4046_v10 = vcombine.high %v161_v5, %v165_v6 }
 0x141   :  { %2852 = vmatprep.subr.bf16.mxu0 %v4036_v11  ;;  %v216_v11 = vld [vmem:[#allocation2 + $0x310] sm:$0xff] }
 0x144   :  { %2853 = vmatpush1.bf16.msra.mxu0 %v4035_v16  ;;  %v4045_v16 = vcombine.low %v161_v5, %v165_v6  ;;  %v268_v5 = vld [vmem:[#allocation2 + $0x4b0] sm:$0xff]  ;;  %v217_v6 = vld [vmem:[#allocation2 + $0x318] sm:$0xff] }
 0x145   :  { %4392 = vmatmul.mubr.msk.bf16.vlgmr.msra.gmra.mrb[4].mxu1 %vm2512_vm0, %v5018_v19  ;;  %2854 = vmatprep.subr.bf16.mxu0 %v4044_v18  ;;  %v4054_v18 = vcombine.high %v169_v13, %v173_v14  ;;  %v276_v13 = vld [vmem:[#allocation2 + $0x4f0] sm:$0xff]  ;;  %v225_v14 = vld [vmem:[#allocation2 + $0x358] sm:$0xff] }
 0x146   :  { %2968 = vmatpush1.bf16.msra.mxu1 %v4387_v17  ;;  %2999 = vmatprep.mubr.bf16.mxu1 %v4898_v0  ;;  %v4100_v17 = vcombine.high %v216_v11, %v220_v12 }
 0x147   :  { %3008 = vmatprep.subr.bf16.mxu1 %v4006_v21  ;;  %v224_v21 = vld [vmem:[#allocation2 + $0x350] sm:$0xff] }
 0x148   :  { %2855 = vmatpush1.bf16.msra.mxu0 %v4043_v25  ;;  %v181_v25 = vld [vmem:[#allocation2 + $0x1f8] sm:$0xff]  ;;  %v4108_v28 = vcombine.high %v224_v21, %v228_v22 }
 0x149   :  { %2856 = vmatprep.subr.bf16.mxu0 %v4052_v26  ;;  %v4099_v26 = vcombine.low %v216_v11, %v220_v12  ;;  %v4062_v29 = vcombine.high %v177_v23, %v181_v25  ;;  %v4061_v35 = vcombine.low %v177_v23, %v181_v25  ;;  %v272_v12 = vld [vmem:[#allocation2 + $0x4d0] sm:$0xff]  ;;  %v233_v25 = vld [vmem:[#allocation2 + $0x398] sm:$0xff] }
 0x14a   :  { %v284_v23 = vld [vmem:[#allocation2 + $0x530] sm:$0xff] }
 0x14c   :  { %v5069_v39 = vpop.f32.mrb[0].mxu1  ;;  %2857 = vmatpush1.bf16.msra.mxu0 %v4051_v31  ;;  %v236_v31 = vld [vmem:[#allocation2 + $0x3b0] sm:$0xff] }
 0x14d   :  { %v5071_v42 = vpop.f32.mrb[1].mxu1  ;;  %4393 = vmatmul.mubr.msk.bf16.vlgmr.msra.gmra.mrb[8].mxu1 %vm2512_vm0, %v5018_v19  ;;  %2858 = vmatprep.subr.bf16.mxu0 %v4060_v33  ;;  %v189_v33 = vld [vmem:[#allocation2 + $0x238] sm:$0xff]  ;;  %v4116_v37 = vcombine.high %v232_v30, %v236_v31 }
 0x14e   :  { %3009 = vmatpush1.bf16.msra.mxu1 %v4005_v32  ;;  %v2677_v44 = vpop.f32.mrb[2].mxu1  ;;  %3040 = vmatprep.mubr.bf16.mxu1 %v5025_v60  ;;  %v4084_v60 = vcombine.high %v200_v58, %v204_v59  ;;  %v185_v32 = vld [vmem:[#allocation2 + $0x218] sm:$0xff]  ;;  %v256_v59 = vld [vmem:[#allocation2 + $0x450] sm:$0xff] }
 0x14f   :  { %v2678_v47 = vpop.f32.mrb[3].mxu1  ;;  %3010 = vmatprep.subr.bf16.mxu1 %v4014_v34  ;;  %v4107_v34 = vcombine.low %v224_v21, %v228_v22  ;;  %v4070_v40 = vcombine.high %v185_v32, %v189_v33  ;;  %v193_v44 = vld [vmem:[#allocation2 + $0x258] sm:$0xff]  ;;  %v280_v22 = vld [vmem:[#allocation2 + $0x510] sm:$0xff] }
 0x150   :  { %2859 = vmatpush1.bf16.msra.mxu0 %v4059_v43  ;;  %v244_v43 = vld [vmem:[#allocation2 + $0x3f0] sm:$0xff]  ;;  %v4069_v47 = vcombine.low %v185_v32, %v189_v33  ;;  %v241_v33 = vld [vmem:[#allocation2 + $0x3d8] sm:$0xff] }
 0x151   :  { %2860 = vmatprep.subr.bf16.mxu0 %v4068_v46  ;;  %v4115_v46 = vcombine.low %v232_v30, %v236_v31  ;;  %v288_v31 = vld [vmem:[#allocation2 + $0x550] sm:$0xff] }
 0x152   :  { %3011 = vmatpush1.bf16.msra.mxu1 %v4013_v45  ;;  %v197_v45 = vld [vmem:[#allocation2 + $0x278] sm:$0xff]  ;;  %v292_v32 = vld [vmem:[#allocation2 + $0x570] sm:$0xff] }
 0x153   :  { %3012 = vmatprep.subr.bf16.mxu1 %v4022_v48  ;;  %v4124_v48 = vcombine.high %v240_v41, %v244_v43  ;;  %v4078_v49 = vcombine.high %v193_v44, %v197_v45 }
 0x154   :  { %2861 = vmatpush1.bf16.msra.mxu0 %v4067_v54  ;;  %v205_v54 = vld [vmem:[#allocation2 + $0x2b8] sm:$0xff] }
 0x155   :  { %2862 = vmatprep.subr.bf16.mxu0 %v4076_v56  ;;  %v4077_v56 = vcombine.low %v193_v44, %v197_v45  ;;  %v4086_v58 = vcombine.high %v201_v53, %v205_v54  ;;  %v300_v44 = vld [vmem:[#allocation2 + $0x5b0] sm:$0xff]  ;;  %v249_v45 = vld [vmem:[#allocation2 + $0x418] sm:$0xff] }
 0x156   :  { %3013 = vmatpush1.bf16.msra.mxu1 %v4021_v55  ;;  %v4123_v55 = vcombine.low %v240_v41, %v244_v43  ;;  %v296_v43 = vld [vmem:[#allocation2 + $0x590] sm:$0xff] }
 0x157   :  { %3014 = vmatprep.subr.bf16.mxu1 %v4030_v57  ;;  %v4132_v57 = vcombine.high %v248_v50, %v252_v52 }
 0x158   :  { %2863 = vmatpush1.bf16.msra.mxu0 %v4075_v63  ;;  %v213_v63 = vld [vmem:[#allocation2 + $0x2f8] sm:$0xff] }
 0x159   :  { %2864 = vmatprep.subr.bf16.mxu0 %v4084_v60  ;;  %v4085_v60 = vcombine.low %v201_v53, %v205_v54  ;;  %v4094_v3 = vcombine.high %v209_v62, %v213_v63  ;;  %v308_v53 = vld [vmem:[#allocation2 + $0x5f0] sm:$0xff]  ;;  %v257_v54 = vld [vmem:[#allocation2 + $0x458] sm:$0xff] }
 0x15a   :  { %3015 = vmatpush1.bf16.msra.mxu1 %v4029_v1  ;;  %v4131_v1 = vcombine.low %v248_v50, %v252_v52  ;;  %v304_v52 = vld [vmem:[#allocation2 + $0x5d0] sm:$0xff] }
 0x15b   :  { %3016 = vmatprep.subr.bf16.mxu1 %v4038_v2  ;;  %v4140_v2 = vcombine.high %v256_v59, %v260_v61 }
 0x15c   :  { %2865 = vmatpush1.bf16.msra.mxu0 %v4083_v7  ;;  %v221_v7 = vld [vmem:[#allocation2 + $0x338] sm:$0xff] }
 0x15d   :  { %2866 = vmatprep.subr.bf16.mxu0 %v4092_v9  ;;  %v4093_v9 = vcombine.low %v209_v62, %v213_v63  ;;  %v4102_v11 = vcombine.high %v217_v6, %v221_v7  ;;  %v316_v62 = vld [vmem:[#allocation2 + $0x630] sm:$0xff]  ;;  %v265_v63 = vld [vmem:[#allocation2 + $0x498] sm:$0xff] }
 0x15e   :  { %3017 = vmatpush1.bf16.msra.mxu1 %v4037_v8  ;;  %v4139_v8 = vcombine.low %v256_v59, %v260_v61  ;;  %v312_v61 = vld [vmem:[#allocation2 + $0x610] sm:$0xff] }
 0x15f   :  { %3018 = vmatprep.subr.bf16.mxu1 %v4046_v10  ;;  %v4148_v10 = vcombine.high %v264_v4, %v268_v5 }
 0x160   :  { %2867 = vmatpush1.bf16.msra.mxu0 %v4091_v15  ;;  %v229_v15 = vld [vmem:[#allocation2 + $0x378] sm:$0xff] }
 0x161   :  { %2868 = vmatprep.subr.bf16.mxu0 %v4100_v17  ;;  %v4101_v17 = vcombine.low %v217_v6, %v221_v7  ;;  %v4110_v21 = vcombine.high %v225_v14, %v229_v15  ;;  %v324_v6 = vld [vmem:[#allocation2 + $0x670] sm:$0xff]  ;;  %v273_v7 = vld [vmem:[#allocation2 + $0x4d8] sm:$0xff] }
 0x162   :  { %3019 = vmatpush1.bf16.msra.mxu1 %v4045_v16  ;;  %v4147_v16 = vcombine.low %v264_v4, %v268_v5  ;;  %v320_v5 = vld [vmem:[#allocation2 + $0x650] sm:$0xff] }
 0x163   :  { %3020 = vmatprep.subr.bf16.mxu1 %v4054_v18  ;;  %v4156_v18 = vcombine.high %v272_v12, %v276_v13 }
 0x164   :  { %2869 = vmatpush1.bf16.msra.mxu0 %v4099_v26  ;;  %v237_v26 = vld [vmem:[#allocation2 + $0x3b8] sm:$0xff] }
 0x165   :  { %2870 = vmatprep.subr.bf16.mxu0 %v4108_v28  ;;  %v4109_v28 = vcombine.low %v225_v14, %v229_v15  ;;  %v4118_v30 = vcombine.high %v233_v25, %v237_v26  ;;  %v281_v14 = vld [vmem:[#allocation2 + $0x518] sm:$0xff] }
 0x166   :  { %3021 = vmatpush1.bf16.msra.mxu1 %v4053_v27  ;;  %v4155_v27 = vcombine.low %v272_v12, %v276_v13  ;;  %v328_v12 = vld [vmem:[#allocation2 + $0x690] sm:$0xff]  ;;  %v285_v15 = vld [vmem:[#allocation2 + $0x538] sm:$0xff] }
 0x167   :  { %3022 = vmatprep.subr.bf16.mxu1 %v4062_v29  ;;  %v4164_v29 = vcombine.high %v280_v22, %v284_v23  ;;  %v332_v13 = vld [vmem:[#allocation2 + $0x6b0] sm:$0xff] }
 0x168   :  { %2871 = vmatpush1.bf16.msra.mxu0 %v4107_v34  ;;  %v245_v34 = vld [vmem:[#allocation2 + $0x3f8] sm:$0xff] }
 0x169   :  { %2872 = vmatprep.subr.bf16.mxu0 %v4116_v37  ;;  %v4117_v37 = vcombine.low %v233_v25, %v237_v26  ;;  %v4126_v41 = vcombine.high %v241_v33, %v245_v34  ;;  %v293_v25 = vld [vmem:[#allocation2 + $0x578] sm:$0xff]  ;;  %v4211_v26 = vcombine.low %v328_v12, %v332_v13 }
 0x16a   :  { %3023 = vmatpush1.bf16.msra.mxu1 %v4061_v35  ;;  %v4163_v35 = vcombine.low %v280_v22, %v284_v23  ;;  %v340_v22 = vld [vmem:[#allocation2 + $0x6f0] sm:$0xff]  ;;  %v289_v23 = vld [vmem:[#allocation2 + $0x558] sm:$0xff] }
 0x16b   :  { %3024 = vmatprep.subr.bf16.mxu1 %v4070_v40  ;;  %v4172_v40 = vcombine.high %v288_v31, %v292_v32 }
 0x16c   :  { %2873 = vmatpush1.bf16.msra.mxu0 %v4115_v46  ;;  %v253_v46 = vld [vmem:[#allocation2 + $0x438] sm:$0xff] }
 0x16d   :  { %2874 = vmatprep.subr.bf16.mxu0 %v4124_v48  ;;  %v4125_v48 = vcombine.low %v241_v33, %v245_v34  ;;  %v4134_v50 = vcombine.high %v249_v45, %v253_v46  ;;  %v301_v33 = vld [vmem:[#allocation2 + $0x5b8] sm:$0xff] }
 0x16e   :  { %3025 = vmatpush1.bf16.msra.mxu1 %v4069_v47  ;;  %v4171_v47 = vcombine.low %v288_v31, %v292_v32  ;;  %v348_v31 = vld [vmem:[#allocation2 + $0x730] sm:$0xff]  ;;  %v297_v32 = vld [vmem:[#allocation2 + $0x598] sm:$0xff] }
 0x16f   :  { %3026 = vmatprep.subr.bf16.mxu1 %v4078_v49  ;;  %v4180_v49 = vcombine.high %v296_v43, %v300_v44 }
 0x170   :  { %2875 = vmatpush1.bf16.msra.mxu0 %v4123_v55  ;;  %v261_v55 = vld [vmem:[#allocation2 + $0x478] sm:$0xff] }
 0x171   :  { %2885 = vmatprep.subr.bf16.mxu0 %v4132_v57  ;;  %v4133_v57 = vcombine.low %v249_v45, %v253_v46  ;;  %v4142_v59 = vcombine.high %v257_v54, %v261_v55  ;;  %v309_v45 = vld [vmem:[#allocation2 + $0x5f8] sm:$0xff] }
 0x172   :  { %3027 = vmatpush1.bf16.msra.mxu1 %v4077_v56  ;;  %v4179_v56 = vcombine.low %v296_v43, %v300_v44  ;;  %v356_v43 = vld [vmem:[#allocation2 + $0x770] sm:$0xff]  ;;  %v305_v44 = vld [vmem:[#allocation2 + $0x5d8] sm:$0xff] }
 0x173   :  { %3028 = vmatprep.subr.bf16.mxu1 %v4086_v58  ;;  %2877 = vmatmul.mubr.bf16.vlgmr.msra.gmra.mrb[4].mxu0 %v5035_v20  ;;  %v4188_v58 = vcombine.high %v304_v52, %v308_v53 }
 0x174   :  { %2886 = vmatpush1.bf16.msra.mxu0 %v4131_v1  ;;  %2917 = vmatprep.mubr.bf16.mxu0 %v5037_v24  ;;  %v269_v1 = vld [vmem:[#allocation2 + $0x4b8] sm:$0xff] }
 0x175   :  { %2887 = vmatprep.subr.bf16.mxu0 %v4140_v2  ;;  %v4141_v2 = vcombine.low %v257_v54, %v261_v55  ;;  %v4150_v4 = vcombine.high %v265_v63, %v269_v1  ;;  %v317_v54 = vld [vmem:[#allocation2 + $0x638] sm:$0xff] }
 0x176   :  { %3029 = vmatpush1.bf16.msra.mxu1 %v4085_v60  ;;  %v4187_v60 = vcombine.low %v304_v52, %v308_v53  ;;  %v364_v52 = vld [vmem:[#allocation2 + $0x7b0] sm:$0xff]  ;;  %v313_v53 = vld [vmem:[#allocation2 + $0x618] sm:$0xff] }
 0x177   :  { %3030 = vmatprep.subr.bf16.mxu1 %v4094_v3  ;;  %v4196_v3 = vcombine.high %v312_v61, %v316_v62 }
 0x178   :  { %2888 = vmatpush1.bf16.msra.mxu0 %v4139_v8  ;;  %v277_v8 = vld [vmem:[#allocation2 + $0x4f8] sm:$0xff] }
 0x179   :  { %2889 = vmatprep.subr.bf16.mxu0 %v4148_v10  ;;  %v4149_v10 = vcombine.low %v265_v63, %v269_v1  ;;  %v325_v63 = vld [vmem:[#allocation2 + $0x678] sm:$0xff] }
 0x17a   :  { %3031 = vmatpush1.bf16.msra.mxu1 %v4093_v9  ;;  %v4195_v9 = vcombine.low %v312_v61, %v316_v62  ;;  %v372_v61 = vld [vmem:[#allocation2 + $0x7f0] sm:$0xff]  ;;  %v321_v62 = vld [vmem:[#allocation2 + $0x658] sm:$0xff] }
 0x17b   :  { %3032 = vmatprep.subr.bf16.mxu1 %v4102_v11  ;;  %v4158_v11 = vcombine.high %v273_v7, %v277_v8 }
 0x17c   :  { %2890 = vmatpush1.bf16.msra.mxu0 %v4147_v16  ;;  %v4203_v16 = vcombine.low %v320_v5, %v324_v6 }
 0x17d   :  { %2891 = vmatprep.subr.bf16.mxu0 %v4156_v18  ;;  %v4166_v18 = vcombine.high %v281_v14, %v285_v15 }
 0x17e   :  { %3033 = vmatpush1.bf16.msra.mxu1 %v4101_v17  ;;  %v4157_v17 = vcombine.low %v273_v7, %v277_v8  ;;  %v333_v7 = vld [vmem:[#allocation2 + $0x6b8] sm:$0xff] }
 0x17f   :  { %3034 = vmatprep.subr.bf16.mxu1 %v4110_v21  ;;  %v336_v21 = vld [vmem:[#allocation2 + $0x6d0] sm:$0xff] }
 0x180   :  { %2892 = vmatpush1.bf16.msra.mxu0 %v4155_v27  ;;  %v4165_v27 = vcombine.low %v281_v14, %v285_v15  ;;  %v4219_v34 = vcombine.low %v336_v21, %v340_v22  ;;  %v341_v14 = vld [vmem:[#allocation2 + $0x6f8] sm:$0xff] }
 0x181   :  { %2893 = vmatprep.subr.bf16.mxu0 %v4164_v29  ;;  %v4174_v29 = vcombine.high %v289_v23, %v293_v25 }
 0x182   :  { %3035 = vmatpush1.bf16.msra.mxu1 %v4109_v28  ;;  %v4220_v28 = vcombine.high %v336_v21, %v340_v22  ;;  %v396_v21 = vld [vmem:[#allocation2 + $0x8b0] sm:$0xff]  ;;  %v345_v22 = vld [vmem:[#allocation2 + $0x718] sm:$0xff] }
 0x183   :  { %3036 = vmatprep.subr.bf16.mxu1 %v4118_v30  ;;  %v344_v30 = vld [vmem:[#allocation2 + $0x710] sm:$0xff] }
 0x184   :  { %2894 = vmatpush1.bf16.msra.mxu0 %v4163_v35  ;;  %v4173_v35 = vcombine.low %v289_v23, %v293_v25  ;;  %v4227_v46 = vcombine.low %v344_v30, %v348_v31  ;;  %v349_v23 = vld [vmem:[#allocation2 + $0x738] sm:$0xff] }
 0x185   :  { %2895 = vmatprep.subr.bf16.mxu0 %v4172_v40  ;;  %v4182_v40 = vcombine.high %v297_v32, %v301_v33 }
 0x186   :  { %3037 = vmatpush1.bf16.msra.mxu1 %v4117_v37  ;;  %v4228_v37 = vcombine.high %v344_v30, %v348_v31  ;;  %v404_v30 = vld [vmem:[#allocation2 + $0x8f0] sm:$0xff]  ;;  %v353_v31 = vld [vmem:[#allocation2 + $0x758] sm:$0xff] }
 0x187   :  { %3038 = vmatprep.subr.bf16.mxu1 %v4126_v41  ;;  %v352_v41 = vld [vmem:[#allocation2 + $0x750] sm:$0xff] }
 0x188   :  { %2896 = vmatpush1.bf16.msra.mxu0 %v4171_v47  ;;  %v4181_v47 = vcombine.low %v297_v32, %v301_v33  ;;  %v4235_v55 = vcombine.low %v352_v41, %v356_v43  ;;  %v357_v32 = vld [vmem:[#allocation2 + $0x778] sm:$0xff] }
 0x189   :  { %2897 = vmatprep.subr.bf16.mxu0 %v4180_v49  ;;  %v4190_v49 = vcombine.high %v305_v44, %v309_v45 }
 0x18a   :  { %3039 = vmatpush1.bf16.msra.mxu1 %v4125_v48  ;;  %v4236_v48 = vcombine.high %v352_v41, %v356_v43  ;;  %v412_v41 = vld [vmem:[#allocation2 + $0x930] sm:$0xff]  ;;  %v361_v43 = vld [vmem:[#allocation2 + $0x798] sm:$0xff] }
 0x18b   :  { %3049 = vmatprep.subr.bf16.mxu1 %v4134_v50  ;;  %v360_v50 = vld [vmem:[#allocation2 + $0x790] sm:$0xff] }
 0x18c   :  { %2898 = vmatpush1.bf16.msra.mxu0 %v4179_v56  ;;  %v4189_v56 = vcombine.low %v305_v44, %v309_v45  ;;  %v4243_v1 = vcombine.low %v360_v50, %v364_v52  ;;  %v365_v44 = vld [vmem:[#allocation2 + $0x7b8] sm:$0xff] }
 0x18d   :  { %3041 = vmatmul.mubr.bf16.vlgmr.msra.gmra.mrb[12].mxu1 %v5035_v20  ;;  %2899 = vmatprep.subr.bf16.mxu0 %v4188_v58  ;;  %v4204_v20 = vcombine.high %v320_v5, %v324_v6  ;;  %v4198_v58 = vcombine.high %v313_v53, %v317_v54  ;;  %v380_v5 = vld [vmem:[#allocation2 + $0x830] sm:$0xff]  ;;  %v329_v6 = vld [vmem:[#allocation2 + $0x698] sm:$0xff] }
 0x18e   :  { %3050 = vmatpush1.bf16.msra.mxu1 %v4133_v57  ;;  %3081 = vmatprep.mubr.bf16.mxu1 %v5037_v24  ;;  %v4212_v24 = vcombine.high %v328_v12, %v332_v13  ;;  %v4244_v57 = vcombine.high %v360_v50, %v364_v52  ;;  %v388_v12 = vld [vmem:[#allocation2 + $0x870] sm:$0xff]  ;;  %v337_v13 = vld [vmem:[#allocation2 + $0x6d8] sm:$0xff] }
 0x18f   :  { %3051 = vmatprep.subr.bf16.mxu1 %v4142_v59  ;;  %v368_v59 = vld [vmem:[#allocation2 + $0x7d0] sm:$0xff]  ;;  %v369_v52 = vld [vmem:[#allocation2 + $0x7d8] sm:$0xff] }
 0x190   :  { %2900 = vmatpush1.bf16.msra.mxu0 %v4187_v60  ;;  %v4197_v60 = vcombine.low %v313_v53, %v317_v54  ;;  %v4251_v8 = vcombine.low %v368_v59, %v372_v61  ;;  %v420_v50 = vld [vmem:[#allocation2 + $0x970] sm:$0xff]  ;;  %v373_v53 = vld [vmem:[#allocation2 + $0x7f8] sm:$0xff] }
 0x191   :  { %2901 = vmatprep.subr.bf16.mxu0 %v4196_v3  ;;  %v4206_v3 = vcombine.high %v321_v62, %v325_v63 }
 0x192   :  { %3052 = vmatpush1.bf16.msra.mxu1 %v4141_v2  ;;  %v4252_v2 = vcombine.high %v368_v59, %v372_v61  ;;  %v428_v59 = vld [vmem:[#allocation2 + $0x9b0] sm:$0xff]  ;;  %v377_v61 = vld [vmem:[#allocation2 + $0x818] sm:$0xff] }
 0x193   :  { %3053 = vmatprep.subr.bf16.mxu1 %v4150_v4  ;;  %v376_v4 = vld [vmem:[#allocation2 + $0x810] sm:$0xff] }
 0x194   :  { %2902 = vmatpush1.bf16.msra.mxu0 %v4195_v9  ;;  %v4205_v9 = vcombine.low %v321_v62, %v325_v63  ;;  %v4259_v15 = vcombine.low %v376_v4, %v380_v5  ;;  %v381_v62 = vld [vmem:[#allocation2 + $0x838] sm:$0xff] }
 0x195   :  { %2903 = vmatprep.subr.bf16.mxu0 %v4204_v20  ;;  %v4214_v20 = vcombine.high %v329_v6, %v333_v7 }
 0x196   :  { %3054 = vmatpush1.bf16.msra.mxu1 %v4149_v10  ;;  %v4260_v10 = vcombine.high %v376_v4, %v380_v5  ;;  %v436_v4 = vld [vmem:[#allocation2 + $0x9f0] sm:$0xff]  ;;  %v385_v5 = vld [vmem:[#allocation2 + $0x858] sm:$0xff] }
 0x197   :  { %3055 = vmatprep.subr.bf16.mxu1 %v4158_v11  ;;  %v384_v11 = vld [vmem:[#allocation2 + $0x850] sm:$0xff] }
 0x198   :  { %2904 = vmatpush1.bf16.msra.mxu0 %v4203_v16  ;;  %v4213_v16 = vcombine.low %v329_v6, %v333_v7  ;;  %v4267_v25 = vcombine.low %v384_v11, %v388_v12  ;;  %v389_v6 = vld [vmem:[#allocation2 + $0x878] sm:$0xff] }
 0x199   :  { %2905 = vmatprep.subr.bf16.mxu0 %v4212_v24  ;;  %v4222_v24 = vcombine.high %v337_v13, %v341_v14 }
 0x19a   :  { %3056 = vmatpush1.bf16.msra.mxu1 %v4157_v17  ;;  %v4268_v17 = vcombine.high %v384_v11, %v388_v12  ;;  %v444_v11 = vld [vmem:[#allocation2 + $0xa30] sm:$0xff]  ;;  %v393_v12 = vld [vmem:[#allocation2 + $0x898] sm:$0xff] }
 0x19b   :  { %3057 = vmatprep.subr.bf16.mxu1 %v4166_v18  ;;  %v392_v18 = vld [vmem:[#allocation2 + $0x890] sm:$0xff] }
 0x19c   :  { %2906 = vmatpush1.bf16.msra.mxu0 %v4211_v26  ;;  %v4221_v26 = vcombine.low %v337_v13, %v341_v14  ;;  %v4275_v33 = vcombine.low %v392_v18, %v396_v21  ;;  %v397_v13 = vld [vmem:[#allocation2 + $0x8b8] sm:$0xff] }
 0x19d   :  { %2907 = vmatprep.subr.bf16.mxu0 %v4220_v28  ;;  %v4230_v28 = vcombine.high %v345_v22, %v349_v23 }
 0x19e   :  { %3058 = vmatpush1.bf16.msra.mxu1 %v4165_v27  ;;  %v4276_v27 = vcombine.high %v392_v18, %v396_v21  ;;  %v452_v18 = vld [vmem:[#allocation2 + $0xa70] sm:$0xff]  ;;  %v401_v21 = vld [vmem:[#allocation2 + $0x8d8] sm:$0xff] }
 0x19f   :  { %3059 = vmatprep.subr.bf16.mxu1 %v4174_v29  ;;  %v400_v29 = vld [vmem:[#allocation2 + $0x8d0] sm:$0xff] }
 0x1a0   :  { %2908 = vmatpush1.bf16.msra.mxu0 %v4219_v34  ;;  %v4229_v34 = vcombine.low %v345_v22, %v349_v23  ;;  %v4283_v45 = vcombine.low %v400_v29, %v404_v30  ;;  %v405_v22 = vld [vmem:[#allocation2 + $0x8f8] sm:$0xff] }
 0x1a1   :  { %2909 = vmatprep.subr.bf16.mxu0 %v4228_v37  ;;  %v4238_v37 = vcombine.high %v353_v31, %v357_v32 }
 0x1a2   :  { %3060 = vmatpush1.bf16.msra.mxu1 %v4173_v35  ;;  %v4284_v35 = vcombine.high %v400_v29, %v404_v30  ;;  %v409_v29 = vld [vmem:[#allocation2 + $0x918] sm:$0xff] }
 0x1a3   :  { %3061 = vmatprep.subr.bf16.mxu1 %v4182_v40  ;;  %v408_v40 = vld [vmem:[#allocation2 + $0x910] sm:$0xff]  ;;  %v413_v30 = vld [vmem:[#allocation2 + $0x938] sm:$0xff] }
 0x1a4   :  { %2910 = vmatpush1.bf16.msra.mxu0 %v4227_v46  ;;  %v4237_v46 = vcombine.low %v353_v31, %v357_v32  ;;  %v4291_v54 = vcombine.low %v408_v40, %v412_v41  ;;  %v4285_v32 = vcombine.low %v401_v21, %v405_v22 }
 0x1a5   :  { %2911 = vmatprep.subr.bf16.mxu0 %v4236_v48  ;;  %v4246_v48 = vcombine.high %v361_v43, %v365_v44 }
 0x1a6   :  { %3062 = vmatpush1.bf16.msra.mxu1 %v4181_v47  ;;  %v4292_v47 = vcombine.high %v408_v40, %v412_v41  ;;  %v421_v40 = vld [vmem:[#allocation2 + $0x978] sm:$0xff] }
 0x1a7   :  { %3063 = vmatprep.subr.bf16.mxu1 %v4190_v49  ;;  %v416_v49 = vld [vmem:[#allocation2 + $0x950] sm:$0xff] }
 0x1a8   :  { %2912 = vmatpush1.bf16.msra.mxu0 %v4235_v55  ;;  %v4245_v55 = vcombine.low %v361_v43, %v365_v44  ;;  %v4299_v63 = vcombine.low %v416_v49, %v420_v50  ;;  %v4293_v43 = vcombine.low %v409_v29, %v413_v30 }
 0x1a9   :  { %2913 = vmatprep.subr.bf16.mxu0 %v4244_v57  ;;  %v4254_v57 = vcombine.high %v369_v52, %v373_v53 }
 0x1aa   :  { %3064 = vmatpush1.bf16.msra.mxu1 %v4189_v56  ;;  %v4300_v56 = vcombine.high %v416_v49, %v420_v50  ;;  %v429_v49 = vld [vmem:[#allocation2 + $0x9b8] sm:$0xff] }
 0x1ab   :  { %3065 = vmatprep.subr.bf16.mxu1 %v4198_v58  ;;  %v424_v58 = vld [vmem:[#allocation2 + $0x990] sm:$0xff] }
 0x1ac   :  { %2914 = vmatpush1.bf16.msra.mxu0 %v4243_v1  ;;  %v4253_v1 = vcombine.low %v369_v52, %v373_v53  ;;  %v4307_v7 = vcombine.low %v424_v58, %v428_v59 }
 0x1ad   :  { %2915 = vmatprep.subr.bf16.mxu0 %v4252_v2  ;;  %v4262_v2 = vcombine.high %v377_v61, %v381_v62 }
 0x1ae   :  { %3066 = vmatpush1.bf16.msra.mxu1 %v4197_v60  ;;  %v4308_v60 = vcombine.high %v424_v58, %v428_v59  ;;  %v437_v58 = vld [vmem:[#allocation2 + $0x9f8] sm:$0xff] }
 0x1af   :  { %3067 = vmatprep.subr.bf16.mxu1 %v4206_v3  ;;  %v432_v3 = vld [vmem:[#allocation2 + $0x9d0] sm:$0xff] }
 0x1b0   :  { %2916 = vmatpush1.bf16.msra.mxu0 %v4251_v8  ;;  %v4261_v8 = vcombine.low %v377_v61, %v381_v62  ;;  %v4315_v14 = vcombine.low %v432_v3, %v436_v4 }
 0x1b1   :  { %2926 = vmatprep.subr.bf16.mxu0 %v4260_v10  ;;  %v4270_v10 = vcombine.high %v385_v5, %v389_v6 }
 0x1b2   :  { %3068 = vmatpush1.bf16.msra.mxu1 %v4205_v9  ;;  %v4316_v9 = vcombine.high %v432_v3, %v436_v4  ;;  %v445_v3 = vld [vmem:[#allocation2 + $0xa38] sm:$0xff] }
 0x1b3   :  { %3069 = vmatprep.subr.bf16.mxu1 %v4214_v20  ;;  %2918 = vmatmul.mubr.bf16.vlgmr.msra.gmra.mrb[4].mxu0 %v5049_v36  ;;  %v440_v20 = vld [vmem:[#allocation2 + $0xa10] sm:$0xff] }
 0x1b4   :  { %2927 = vmatpush1.bf16.msra.mxu0 %v4259_v15  ;;  %2958 = vmatprep.mubr.bf16.mxu0 %v5051_v38  ;;  %v4269_v15 = vcombine.low %v385_v5, %v389_v6  ;;  %v4323_v23 = vcombine.low %v440_v20, %v444_v11 }
 0x1b5   :  { %2928 = vmatprep.subr.bf16.mxu0 %v4268_v17  ;;  %v4278_v17 = vcombine.high %v393_v12, %v397_v13 }
 0x1b6   :  { %3070 = vmatpush1.bf16.msra.mxu1 %v4213_v16  ;;  %v4324_v16 = vcombine.high %v440_v20, %v444_v11  ;;  %v453_v20 = vld [vmem:[#allocation2 + $0xa78] sm:$0xff] }
 0x1b7   :  { %3071 = vmatprep.subr.bf16.mxu1 %v4222_v24  ;;  %v448_v24 = vld [vmem:[#allocation2 + $0xa50] sm:$0xff] }
 0x1b8   :  { %2929 = vmatpush1.bf16.msra.mxu0 %v4267_v25  ;;  %v4277_v25 = vcombine.low %v393_v12, %v397_v13  ;;  %v4331_v31 = vcombine.low %v448_v24, %v452_v18 }
 0x1b9   :  { %2930 = vmatprep.subr.bf16.mxu0 %v4276_v27  ;;  %v456_v27 = vld [vmem:[#allocation2 + $0xa90] sm:$0xff] }
 0x1ba   :  { %3072 = vmatpush1.bf16.msra.mxu1 %v4221_v26  ;;  %v4286_v26 = vcombine.high %v401_v21, %v405_v22  ;;  %v465_v22 = vld [vmem:[#allocation2 + $0xad8] sm:$0xff] }
 0x1bb   :  { %3073 = vmatprep.subr.bf16.mxu1 %v4230_v28  ;;  %v460_v28 = vld [vmem:[#allocation2 + $0xab0] sm:$0xff] }
 0x1bc   :  { %2931 = vmatpush1.bf16.msra.mxu0 %v4275_v33  ;;  %v4294_v33 = vcombine.high %v409_v29, %v413_v30  ;;  %v4339_v41 = vcombine.low %v456_v27, %v460_v28  ;;  %v477_v29 = vld [vmem:[#allocation2 + $0xb38] sm:$0xff]  ;;  %v4655_v30 = vld [vmem:[#allocation7 + $0x8] sm:$0xff]  }
 0x1bd   :  { %2932 = vmatprep.subr.bf16.mxu0 %v4284_v35  ;;  %v468_v35 = vld [vmem:[#allocation2 + $0xaf0] sm:$0xff] }
 0x1be   :  { %3074 = vmatpush1.bf16.msra.mxu1 %v4229_v34  ;;  %v464_v34 = vld [vmem:[#allocation2 + $0xad0] sm:$0xff] }
 0x1bf   :  { %3075 = vmatprep.subr.bf16.mxu1 %v4238_v37  ;;  %v417_v37 = vld [vmem:[#allocation2 + $0x958] sm:$0xff]  ;;  %v4348_v44 = vcombine.high %v464_v34, %v468_v35  ;;  %v4347_v50 = vcombine.low %v464_v34, %v468_v35  ;;  %v512_v35 = vlaneseq }
 0x1c0   :  { %2933 = vmatpush1.bf16.msra.mxu0 %v4283_v45  ;;  %v4302_v45 = vcombine.high %v417_v37, %v421_v40  ;;  %v4301_v52 = vcombine.low %v417_v37, %v421_v40  ;;  %v485_v34 = vld [vmem:[#allocation2 + $0xb78] sm:$0xff] }
 0x1c1   :  { %2934 = vmatprep.subr.bf16.mxu0 %v4292_v47  ;;  %v476_v47 = vld [vmem:[#allocation2 + $0xb30] sm:$0xff]  ;;  %v4657_v37 = vld [vmem:[#allocation7 + $0x10] sm:$0xff]  }
 0x1c2   :  { %3076 = vmatpush1.bf16.msra.mxu1 %v4237_v46  ;;  %v472_v46 = vld [vmem:[#allocation2 + $0xb10] sm:$0xff] }
 0x1c3   :  { %3077 = vmatprep.subr.bf16.mxu1 %v4246_v48  ;;  %v425_v48 = vld [vmem:[#allocation2 + $0x998] sm:$0xff]  ;;  %v4356_v53 = vcombine.high %v472_v46, %v476_v47  ;;  %v4355_v59 = vcombine.low %v472_v46, %v476_v47  ;;  %v5085_v46 = vshrl.u32 %v512_v35, 7  ;;  %v4659_v47 = vld [vmem:[#allocation7 + $0x18] sm:$0xff]  }
 0x1c4   :  { %2935 = vmatpush1.bf16.msra.mxu0 %v4291_v54  ;;  %v4310_v54 = vcombine.high %v425_v48, %v429_v49  ;;  %v4309_v61 = vcombine.low %v425_v48, %v429_v49  ;;  %v4660_v49 = vld [vmem:[#allocation7 + $0x60] sm:$0xff]   ;;  %v4672_v35 = vld [vmem:[#allocation7 + $0xd0] sm:$0xff]  }
 0x1c5   :  { %2936 = vmatprep.subr.bf16.mxu0 %v4300_v56  ;;  %v484_v56 = vld [vmem:[#allocation2 + $0xb70] sm:$0xff] }
 0x1c6   :  { %3078 = vmatpush1.bf16.msra.mxu1 %v4245_v55  ;;  %v480_v55 = vld [vmem:[#allocation2 + $0xb50] sm:$0xff] }
 0x1c7   :  { %3079 = vmatprep.subr.bf16.mxu1 %v4254_v57  ;;  %v433_v57 = vld [vmem:[#allocation2 + $0x9d8] sm:$0xff]  ;;  %v4364_v62 = vcombine.high %v480_v55, %v484_v56  ;;  %v4363_v4 = vcombine.low %v480_v55, %v484_v56  ;;  %v4661_v55 = vld [vmem:[#allocation7 + $0x20] sm:$0xff]   ;;  %v5088_v56 = vld [vmem:[#allocation5] sm:$0xff] }
 0x1c8   :  { %2937 = vmatpush1.bf16.msra.mxu0 %v4299_v63  ;;  %v4318_v63 = vcombine.high %v433_v57, %v437_v58  ;;  %v4317_v5 = vcombine.low %v433_v57, %v437_v58  ;;  %v518_v57 = vsub.s32 1, %v5085_v46 }
 0x1c9   :  { %2938 = vmatprep.subr.bf16.mxu0 %v4308_v60  ;;  %v492_v60 = vld [vmem:[#allocation2 + $0xbb0] sm:$0xff] }
 0x1ca   :  { %3080 = vmatpush1.bf16.msra.mxu1 %v4253_v1  ;;  %v488_v1 = vld [vmem:[#allocation2 + $0xb90] sm:$0xff] }
 0x1cb   :  { %3090 = vmatprep.subr.bf16.mxu1 %v4262_v2  ;;  %v441_v2 = vld [vmem:[#allocation2 + $0xa18] sm:$0xff]  ;;  %v4372_v6 = vcombine.high %v488_v1, %v492_v60  ;;  %v4371_v11 = vcombine.low %v488_v1, %v492_v60  ;;  %v519_v60 = vrot.slane %v5088_v56, %v518_v57  ;;  %v522_v57 = vsub.s32 2, %v5085_v46 }
 0x1cc   :  { %2939 = vmatpush1.bf16.msra.mxu0 %v4307_v7  ;;  %v4326_v7 = vcombine.high %v441_v2, %v445_v3  ;;  %v4325_v12 = vcombine.low %v441_v2, %v445_v3  ;;  %v509_v1 = vld [vmem:[#allocation2 + $0xc38] sm:$0xff]  ;;  %v4663_v2 = vld [vmem:[#allocation7 + $0x28] sm:$0xff]  }
 0x1cd   :  { %3082 = vmatmul.mubr.bf16.vlgmr.msra.gmra.mrb[12].mxu1 %v5049_v36  ;;  %2940 = vmatprep.subr.bf16.mxu0 %v4316_v9  ;;  %v4332_v36 = vcombine.high %v448_v24, %v452_v18  ;;  %v500_v9 = vld [vmem:[#allocation2 + $0xbf0] sm:$0xff]  ;;  %v4652_v18 = vld [vmem:[#allocation7 + $0x40] sm:$0xff]  }
 0x1ce   :  { %3091 = vmatpush1.bf16.msra.mxu1 %v4261_v8  ;;  %3122 = vmatprep.mubr.bf16.mxu1 %v5051_v38  ;;  %v4340_v38 = vcombine.high %v456_v27, %v460_v28  ;;  %v496_v8 = vld [vmem:[#allocation2 + $0xbd0] sm:$0xff]  ;;  %v473_v28 = vld [vmem:[#allocation2 + $0xb18] sm:$0xff] }
 0x1cf   :  { %3092 = vmatprep.subr.bf16.mxu1 %v4270_v10  ;;  %v449_v10 = vld [vmem:[#allocation2 + $0xa58] sm:$0xff]  ;;  %v4380_v13 = vcombine.high %v496_v8, %v500_v9  ;;  %v4357_v40 = vcombine.low %v473_v28, %v477_v29 }
 0x1d0   :  { %2941 = vmatpush1.bf16.msra.mxu0 %v4315_v14  ;;  %v4334_v14 = vcombine.high %v449_v10, %v453_v20  ;;  %v4333_v24 = vcombine.low %v449_v10, %v453_v20  ;;  %v4665_v20 = vld [vmem:[#allocation7 + $0x30] sm:$0xff]  }
 0x1d1   :  { %2942 = vmatprep.subr.bf16.mxu0 %v4324_v16  ;;  %v461_v16 = vld [vmem:[#allocation2 + $0xab8] sm:$0xff] }
 0x1d2   :  { %3093 = vmatpush1.bf16.msra.mxu1 %v4269_v15  ;;  %v457_v15 = vld [vmem:[#allocation2 + $0xa98] sm:$0xff] }
 0x1d3   :  { %3094 = vmatprep.subr.bf16.mxu1 %v4278_v17  ;;  %v4379_v17 = vcombine.low %v496_v8, %v500_v9  ;;  %v4342_v21 = vcombine.high %v457_v15, %v461_v16 }
 0x1d4   :  { %2943 = vmatpush1.bf16.msra.mxu0 %v4323_v23  ;;  %v469_v23 = vld [vmem:[#allocation2 + $0xaf8] sm:$0xff] }
 0x1d5   :  { %2944 = vmatprep.subr.bf16.mxu0 %v4332_v36  ;;  %v4341_v36 = vcombine.low %v457_v15, %v461_v16  ;;  %v4350_v27 = vcombine.high %v465_v22, %v469_v23  ;;  %v4668_v16 = vld [vmem:[#allocation7 + $0xc0] sm:$0xff]  }
 0x1d6   :  { %3095 = vmatpush1.bf16.msra.mxu1 %v4277_v25  ;;  %v4653_v25 = vld [vmem:[#allocation7] sm:$0xff]  }
 0x1d7   :  { %3096 = vmatprep.subr.bf16.mxu1 %v4286_v26  ;;  %v4654_v26 = vld [vmem:[#allocation7 + $0x48] sm:$0xff]  }
 0x1d8   :  { %2945 = vmatpush1.bf16.msra.mxu0 %v4331_v31  ;;  %v4349_v31 = vcombine.low %v465_v22, %v469_v23 }
 0x1d9   :  { %2946 = vmatprep.subr.bf16.mxu0 %v4340_v38  ;;  %v4358_v38 = vcombine.high %v473_v28, %v477_v29  ;;  %v4670_v28 = vld [vmem:[#allocation7 + $0xc8] sm:$0xff]  }
 0x1da   :  { %3097 = vmatpush1.bf16.msra.mxu1 %v4285_v32  ;;  %v4656_v32 = vld [vmem:[#allocation7 + $0x50] sm:$0xff]  }
 0x1db   :  { %3098 = vmatprep.subr.bf16.mxu1 %v4294_v33  ;;  %v481_v33 = vld [vmem:[#allocation2 + $0xb58] sm:$0xff] }
 0x1dc   :  { %2947 = vmatpush1.bf16.msra.mxu0 %v4339_v41  ;;  %v4658_v41 = vld [vmem:[#allocation7 + $0x58] sm:$0xff]   ;;  %v4365_v48 = vcombine.low %v481_v33, %v485_v34 }
 0x1dd   :  { %2948 = vmatprep.subr.bf16.mxu0 %v4348_v44  ;;  %v489_v44 = vld [vmem:[#allocation2 + $0xb98] sm:$0xff] }
 0x1de   :  { %3099 = vmatpush1.bf16.msra.mxu1 %v4293_v43  ;;  %v4366_v43 = vcombine.high %v481_v33, %v485_v34  ;;  %v4690_v33 = vld [vmem:[#allocation7 + $0x158] sm:$0xff]  }
 0x1df   :  { %3100 = vmatprep.subr.bf16.mxu1 %v4302_v45  ;;  %v493_v45 = vld [vmem:[#allocation2 + $0xbb8] sm:$0xff] }
 0x1e0   :  { %2949 = vmatpush1.bf16.msra.mxu0 %v4347_v50  ;;  %v4374_v50 = vcombine.high %v489_v44, %v493_v45  ;;  %v4373_v58 = vcombine.low %v489_v44, %v493_v45  ;;  %v4674_v44 = vld [vmem:[#allocation7 + $0xd8] sm:$0xff]  }
 0x1e1   :  { %2950 = vmatprep.subr.bf16.mxu0 %v4356_v53  ;;  %v497_v53 = vld [vmem:[#allocation2 + $0xbd8] sm:$0xff] }
 0x1e2   :  { %3101 = vmatpush1.bf16.msra.mxu1 %v4301_v52  ;;  %v514_v52 = vsub.s32 0, %v5085_v46 }
 0x1e3   :  { %3102 = vmatprep.subr.bf16.mxu1 %v4310_v54  ;;  %v501_v54 = vld [vmem:[#allocation2 + $0xbf8] sm:$0xff] }
 0x1e4   :  { %2951 = vmatpush1.bf16.msra.mxu0 %v4355_v59  ;;  %v4662_v59 = vld [vmem:[#allocation7 + $0x68] sm:$0xff]   ;;  %v4381_v3 = vcombine.low %v497_v53, %v501_v54 }
 0x1e5   :  { %2952 = vmatprep.subr.bf16.mxu0 %v4364_v62  ;;  %v515_v62 = vrot.slane %v5088_v56, %v514_v52  ;;  %v4694_v52 = vld [vmem:[#allocation7 + $0x168] sm:$0xff]  }
 0x1e6   :  { %3103 = vmatpush1.bf16.msra.mxu1 %v4309_v61  ;;  %v4382_v61 = vcombine.high %v497_v53, %v501_v54  ;;  %v4676_v54 = vld [vmem:[#allocation7 + $0xe0] sm:$0xff]  }
 0x1e7   :  { %3104 = vmatprep.subr.bf16.mxu1 %v4318_v63  ;;  %v505_v63 = vld [vmem:[#allocation2 + $0xc18] sm:$0xff] }
 0x1e8   :  { %2953 = vmatpush1.bf16.msra.mxu0 %v4363_v4  ;;  %v4664_v4 = vld [vmem:[#allocation7 + $0x70] sm:$0xff]  }
 0x1e9   :  { %2954 = vmatprep.subr.bf16.mxu0 %v4372_v6  ;;  %v4390_v6 = vcombine.high %v505_v63, %v509_v1 }
 0x1ea   :  { %3105 = vmatpush1.bf16.msra.mxu1 %v4317_v5 }
 0x1eb   :  { %3106 = vmatprep.subr.bf16.mxu1 %v4326_v7 }
 0x1ec   :  { %2955 = vmatpush1.bf16.msra.mxu0 %v4371_v11 }
 0x1ed   :  { %2956 = vmatprep.subr.bf16.mxu0 %v4380_v13  ;;  %v4389_v13 = vcombine.low %v505_v63, %v509_v1  ;;  %v4681_v63 = vld [vmem:[#allocation7 + $0xb0] sm:$0xff]  }
 0x1ee   :  { %3107 = vmatpush1.bf16.msra.mxu1 %v4325_v12 }
 0x1ef   :  { %3108 = vmatprep.subr.bf16.mxu1 %v4334_v14  ;;  %v4666_v14 = vld [vmem:[#allocation7 + $0x78] sm:$0xff]  }
 0x1f0   :  { %2957 = vmatpush1.bf16.msra.mxu0 %v4379_v17 }
 0x1f1   :  { %4469 = vmatprep.subr.bf16.mxu0 %v4652_v18 }
 0x1f2   :  { %3109 = vmatpush1.bf16.msra.mxu1 %v4333_v24  ;;  %v4667_v24 = vld [vmem:[#allocation7 + $0x38] sm:$0xff]  }
 0x1f3   :  { %3110 = vmatprep.subr.bf16.mxu1 %v4342_v21  ;;  %2959 = vmatmul.mubr.bf16.vlgmr.msra.gmra.mrb[4].mxu0 %v5060_v51  ;;  %v4684_v21 = vld [vmem:[#allocation7 + $0x140] sm:$0xff]  }
 0x1f4   :  { %4470 = vmatpush3.bf16.msra.mxu0 %v4653_v25  ;;  %v4686_v25 = vld [vmem:[#allocation7 + $0x148] sm:$0xff]  }
 0x1f5   :  { %4471 = vmatprep.subr.bf16.mxu0 %v4654_v26 }
 0x1f6   :  { %3111 = vmatpush1.bf16.msra.mxu1 %v4341_v36  ;;  %v4669_v36 = vld [vmem:[#allocation7 + $0x80] sm:$0xff]  }
 0x1f7   :  { %3112 = vmatprep.subr.bf16.mxu1 %v4350_v27  ;;  %v4688_v27 = vld [vmem:[#allocation7 + $0x150] sm:$0xff]  }
 0x1f8   :  { %4472 = vmatpush3.bf16.msra.mxu0 %v4655_v30  ;;  %v4689_v30 = vld [vmem:[#allocation7 + $0x110] sm:$0xff]  }
 0x1f9   :  { %4473 = vmatprep.subr.bf16.mxu0 %v4656_v32 }
 0x1fa   :  { %3113 = vmatpush1.bf16.msra.mxu1 %v4349_v31 }
 0x1fb   :  { %3114 = vmatprep.subr.bf16.mxu1 %v4358_v38  ;;  %v4671_v38 = vld [vmem:[#allocation7 + $0x88] sm:$0xff]  }
 0x1fc   :  { %4474 = vmatpush3.bf16.msra.mxu0 %v4657_v37 }
 0x1fd   :  { %4475 = vmatprep.subr.bf16.mxu0 %v4658_v41 }
 0x1fe   :  { %3115 = vmatpush1.bf16.msra.mxu1 %v4357_v40  ;;  %v4691_v40 = vld [vmem:[#allocation7 + $0x118] sm:$0xff]  }
 0x1ff   :  { %3116 = vmatprep.subr.bf16.mxu1 %v4366_v43  ;;  %v4673_v43 = vld [vmem:[#allocation7 + $0x90] sm:$0xff]  }
 0x200   :  { %4476 = vmatpush3.bf16.msra.mxu0 %v4659_v47 }
 0x201   :  { %4477 = vmatprep.subr.bf16.mxu0 %v4660_v49 }
 0x202   :  { %3117 = vmatpush1.bf16.msra.mxu1 %v4365_v48  ;;  %v4693_v48 = vld [vmem:[#allocation7 + $0x120] sm:$0xff]  }
 0x203   :  { %3118 = vmatprep.subr.bf16.mxu1 %v4374_v50  ;;  %v4675_v50 = vld [vmem:[#allocation7 + $0x98] sm:$0xff]  }
 0x204   :  { %4478 = vmatpush3.bf16.msra.mxu0 %v4661_v55  ;;  %v4677_v55 = vld [vmem:[#allocation7 + $0xa0] sm:$0xff]  }
 0x205   :  { %4479 = vmatprep.subr.bf16.mxu0 %v4662_v59  ;;  %v4679_v59 = vld [vmem:[#allocation7 + $0xa8] sm:$0xff]  }
 0x206   :  { %3119 = vmatpush1.bf16.msra.mxu1 %v4373_v58  ;;  %v2632_v5 = vpop.f32.mrb[0].mxu0  ;;  %v4678_v58 = vld [vmem:[#allocation7 + $0xe8] sm:$0xff]  }
 0x207   :  { %3120 = vmatprep.subr.bf16.mxu1 %v4382_v61  ;;  %v4586_v7 = vadd.f32 %v2632_v5, %v515_v62  ;;  %v2634_v8 = vpop.f32.mrb[1].mxu0  ;;  %v523_v61 = vrot.slane %v5088_v56, %v522_v57  ;;  %v4680_v62 = vld [vmem:[#allocation7 + $0xf0] sm:$0xff]   ;;  %v4695_v5 = vld [vmem:[#allocation7 + $0x128] sm:$0xff]  }
 0x208   :  { %v4588_v9 = vadd.f32 %v2634_v8, %v519_v60  ;;  %v2636_v10 = vpop.f32.mrb[2].mxu0  ;;  %4480 = vmatpush3.bf16.msra.mxu0 %v4663_v2  ;;  %v4682_v60 = vld [vmem:[#allocation7 + $0xf8] sm:$0xff]  }
 0x209   :  { %v4587_v11 = vadd.f32 %v4586_v7, %v5069_v39  ;;  %v2637_v12 = vpop.f32.mrb[3].mxu0  ;;  %4481 = vmatprep.subr.bf16.mxu0 %v4664_v4  ;;  %v4685_v39 = vld [vmem:[#allocation7 + $0x100] sm:$0xff]   ;;  %v4683_v2 = vld [vmem:[#allocation7 + $0xb8] sm:$0xff]   ;;  %v4697_v7 = vld [vmem:[#allocation7 + $0x130] sm:$0xff]  }
 0x20a   :  { %3121 = vmatpush1.bf16.msra.mxu1 %v4381_v3  ;;  %v4589_v15 = vadd.f32 %v4588_v9, %v5071_v42  ;;  %v526_v42 = vsub.s32 3, %v5085_v46  ;;  %v4698_v8 = vld [vmem:[#allocation7 + $0x178] sm:$0xff]   ;;  %v4700_v10 = vld [vmem:[#allocation7 + $0x1c0] sm:$0xff]   ;;  %v4703_v12 = vld [vmem:[#allocation7 + $0x188] sm:$0xff]  }
 0x20b   :  { %3131 = vmatprep.subr.bf16.mxu1 %v4390_v6  ;;  %v3172_v18 = vpack.c.bf16 %v4587_v11, %v4587_v11  ;;  %v4696_v6 = vld [vmem:[#allocation7 + $0x170] sm:$0xff]   ;;  %v4699_v9 = vld [vmem:[#allocation7 + $0x138] sm:$0xff]   ;;  %v4702_v11 = vld [vmem:[#allocation7 + $0x1c8] sm:$0xff]  }
 0x20c   :  { %v3173_v17 = vpack.c.bf16 %v4589_v15, %v4589_v15  ;;  %4482 = vmatpush3.bf16.msra.mxu0 %v4665_v20  ;;  %v527_v26 = vrot.slane %v5088_v56, %v526_v42  ;;  %v4701_v20 = vld [vmem:[#allocation7 + $0x180] sm:$0xff]   ;;  %v4706_v15 = vld [vmem:[#allocation7 + $0x1d8] sm:$0xff]  }
 0x20d   :  { %3123 = vmatmul.mubr.bf16.vlgmr.msra.gmra.mrb[12].mxu1 %v5060_v51  ;;  %4483 = vmatprep.subr.bf16.mxu0 %v4666_v14  ;;  %v3180_v23 = vmul.bf16 %v3172_v18, %v3172_v18  ;;  %v4687_v51 = vld [vmem:[#allocation7 + $0x108] sm:$0xff]   ;;  %v4705_v14 = vld [vmem:[#allocation7 + $0x190] sm:$0xff]   ;;  %v4715_v42 = vld [vmem:[#allocation7 + $0x1b8] sm:$0xff]  }
 0x20e   :  { %3132 = vmatpush1.bf16.msra.mxu1 %v4389_v13  ;;  %v3181_v22 = vmul.bf16 %v3173_v17, %v3173_v17  ;;  %3163 = vmatprep.mubr.bf16.mxu1 %v4898_v0  ;;  %v4704_v13 = vld [vmem:[#allocation7 + $0x1d0] sm:$0xff]   ;;  %v4708_v17 = vld [vmem:[#allocation7 + $0x1e0] sm:$0xff]   ;;  %v4710_v18 = vld [vmem:[#allocation7 + $0x1e8] sm:$0xff]  }
 0x20f   :  { %4491 = vmatprep.subr.bf16.mxu1 %v4668_v16  ;;  %v4707_v16 = vld [vmem:[#allocation7 + $0x198] sm:$0xff]  }
 0x210   :  { %4484 = vmatpush3.bf16.msra.mxu0 %v4667_v24  ;;  %3739 = vmatprep.mubr.bf16.mxu0 %v3181_v22  ;;  %v4709_v24 = vld [vmem:[#allocation7 + $0x1a0] sm:$0xff]   ;;  %v4712_v22 = vld [vmem:[#allocation7 + $0x1f0] sm:$0xff]  }
 0x211   :  { %4513 = vmatprep.subr.bf16.mxu0 %v4684_v21  ;;  %v4711_v21 = vld [vmem:[#allocation7 + $0x1a8] sm:$0xff]  }
 0x213   :  { %3740 = vmatmul.mubr.bf16.vlgmr.msra.gmra.mrb[8].mxu0 %v3180_v23  ;;  %v4714_v23 = vld [vmem:[#allocation7 + $0x1f8] sm:$0xff]  }
 0x214   :  { %4514 = vmatpush3.bf16.msra.mxu0 %v4685_v39  ;;  %v4713_v39 = vld [vmem:[#allocation7 + $0x1b0] sm:$0xff]  }
 0x215   :  { %4515 = vmatprep.subr.bf16.mxu0 %v4686_v25  ;;  %v530_v25 = vsub.s32 4, %v5085_v46 }
 0x218   :  { %v2837_v29 = vpop.f32.mrb[4].mxu1  ;;  %4516 = vmatpush3.bf16.msra.mxu0 %v4687_v51  ;;  %v534_v51 = vsub.s32 5, %v5085_v46 }
 0x219   :  { %4394 = vmatmul.mubr.msk.bf16.vlgmr.msra.gmra.mrb[12].mxu1 %vm2512_vm0, %v5018_v19  ;;  %v2839_v0 = vpop.f32.mrb[5].mxu1  ;;  %4517 = vmatprep.subr.bf16.mxu0 %v4688_v27  ;;  %v4692_v19 = vld [vmem:[#allocation7 + $0x160] sm:$0xff]   ;;  %v4590_v1 = vadd.f32 %v2837_v29, %v523_v61 }
 0x21a   :  { %4492 = vmatpush3.bf16.msra.mxu1 %v4669_v36  ;;  %v4591_v31 = vadd.f32 %v2839_v0, %v527_v26  ;;  %v2841_v32 = vpop.f32.mrb[6].mxu1  ;;  %v531_v36 = vrot.slane %v5088_v56, %v530_v25  ;;  %v535_v26 = vrot.slane %v5088_v56, %v534_v51 }
 0x21b   :  { %v2842_v34 = vpop.f32.mrb[7].mxu1  ;;  %4493 = vmatprep.subr.bf16.mxu1 %v4670_v28  ;;  %v3174_v3 = vpack.c.bf16 %v4590_v1, %v4590_v1 }
 0x21c   :  { %v3175_v37 = vpack.c.bf16 %v4591_v31, %v4591_v31  ;;  %4518 = vmatpush3.bf16.msra.mxu0 %v4689_v30 }
 0x21d   :  { %4519 = vmatprep.subr.bf16.mxu0 %v4690_v33  ;;  %v3182_v4 = vmul.bf16 %v3174_v3, %v3174_v3 }
 0x21e   :  { %v3183_v41 = vmul.bf16 %v3175_v37, %v3175_v37  ;;  %4494 = vmatpush3.bf16.msra.mxu1 %v4671_v38 }
 0x21f   :  { %4495 = vmatprep.subr.bf16.mxu1 %v4672_v35 }
 0x220   :  { %v5101_v45 = vpop.f32.mrb[8].mxu1  ;;  %3779 = vmatprep.mubr.bf16.mxu1 %v3183_v41  ;;  %4520 = vmatpush3.bf16.msra.mxu0 %v4691_v40  ;;  %v538_v40 = vsub.s32 6, %v5085_v46  ;;  %v542_v41 = vsub.s32 7, %v5085_v46  ;;  %v4395_v46 = vld [vmem:[#allocation8] ss:$0 sm:$0xff] }
 0x221   :  { %v5103_v47 = vpop.f32.mrb[9].mxu1  ;;  %4521 = vmatprep.subr.bf16.mxu0 %v4692_v19 }
 0x222   :  { %4496 = vmatpush3.bf16.msra.mxu1 %v4673_v43  ;;  %v3005_v49 = vpop.f32.mrb[10].mxu1 }
 0x223   :  { %v3006_v53 = vpop.f32.mrb[11].mxu1  ;;  %4497 = vmatprep.subr.bf16.mxu1 %v4674_v44  ;;  %v539_v49 = vrot.slane %v5088_v56, %v538_v40 }
 0x224   :  { %4522 = vmatpush3.bf16.msra.mxu0 %v4693_v48 }
 0x225   :  { %4523 = vmatprep.subr.bf16.mxu0 %v4694_v52 }
 0x226   :  { %4498 = vmatpush3.bf16.msra.mxu1 %v4675_v50  ;;  %v543_v50 = vrot.slane %v5088_v56, %v542_v41 }
 0x227   :  { %4499 = vmatprep.subr.bf16.mxu1 %v4676_v54 }
 0x228   :  { %4524 = vmatpush3.bf16.msra.mxu0 %v4695_v5  ;;  %v4716_v5 = vld [vmem:[#allocation10] sm:$0xff]  }
 0x229   :  { %4525 = vmatprep.subr.bf16.mxu0 %v4696_v6  ;;  %v4899_v6 = vmov 0.0  }
 0x22a   :  { %4500 = vmatpush3.bf16.msra.mxu1 %v4677_v55 }
 0x22b   :  { %4501 = vmatprep.subr.bf16.mxu1 %v4678_v58 }
 0x22c   :  { %4526 = vmatpush3.bf16.msra.mxu0 %v4697_v7  ;;  %v4717_v7 = vld [vmem:[#allocation10 + $0x8] sm:$0xff]  }
 0x22d   :  { %4527 = vmatprep.subr.bf16.mxu0 %v4698_v8  ;;  %v4718_v8 = vld [vmem:[#allocation10 + $0x10] sm:$0xff]  }
 0x22e   :  { %4502 = vmatpush3.bf16.msra.mxu1 %v4679_v59 }
 0x22f   :  { %4503 = vmatprep.subr.bf16.mxu1 %v4680_v62 }
 0x230   :  { %4528 = vmatpush3.bf16.msra.mxu0 %v4699_v9  ;;  %v4719_v9 = vld [vmem:[#allocation10 + $0x18] sm:$0xff]  }
 0x231   :  { %4566 = vmatprep.subr.bf16.mxu0 %v4899_v6 }
 0x232   :  { %4504 = vmatpush3.bf16.msra.mxu1 %v4681_v63 }
 0x233   :  { %4505 = vmatprep.subr.bf16.mxu1 %v4682_v60 }
 0x236   :  { %4506 = vmatpush3.bf16.msra.mxu1 %v4683_v2 }
 0x237   :  { %4535 = vmatprep.subr.bf16.mxu1 %v4700_v10  ;;  %v4720_v10 = vld [vmem:[#allocation10 + $0x20] sm:$0xff]  }
 0x239   :  { %3780 = vmatmul.mubr.bf16.vlgmr.msra.gmra.mrb[16].mxu1 %v3182_v4 }
 0x23a   :  { %4536 = vmatpush3.bf16.msra.mxu1 %v4701_v20  ;;  %v4721_v20 = vld [vmem:[#allocation10 + $0x28] sm:$0xff]  }
 0x23b   :  { %4537 = vmatprep.subr.bf16.mxu1 %v4702_v11  ;;  %v4722_v11 = vld [vmem:[#allocation10 + $0x30] sm:$0xff]  }
 0x23e   :  { %4538 = vmatpush3.bf16.msra.mxu1 %v4703_v12  ;;  %v4723_v12 = vld [vmem:[#allocation10 + $0x38] sm:$0xff]  }
 0x23f   :  { %4539 = vmatprep.subr.bf16.mxu1 %v4704_v13 }
 0x242   :  { %4540 = vmatpush3.bf16.msra.mxu1 %v4705_v14 }
 0x243   :  { %4541 = vmatprep.subr.bf16.mxu1 %v4706_v15 }
 0x246   :  { %4542 = vmatpush3.bf16.msra.mxu1 %v4707_v16 }
 0x247   :  { %4543 = vmatprep.subr.bf16.mxu1 %v4708_v17 }
 0x24a   :  { %4544 = vmatpush3.bf16.msra.mxu1 %v4709_v24 }
 0x24b   :  { %4545 = vmatprep.subr.bf16.mxu1 %v4710_v18 }
 0x24e   :  { %4546 = vmatpush3.bf16.msra.mxu1 %v4711_v21 }
 0x24f   :  { %4547 = vmatprep.subr.bf16.mxu1 %v4712_v22 }
 0x252   :  { %4548 = vmatpush3.bf16.msra.mxu1 %v4713_v39 }
 0x253   :  { %4549 = vmatprep.subr.bf16.mxu1 %v4714_v23 }
 0x256   :  { %4550 = vmatpush3.bf16.msra.mxu1 %v4715_v42 }
 0x2c6   :  { %v2960_v27 = vpop.f32.mrb[4].mxu0 }
 0x2c7   :  { %v4592_v28 = vadd.f32 %v2960_v27, %v531_v36  ;;  %v2962_v29 = vpop.f32.mrb[5].mxu0  ;;  %v4460_v36 = vld [vmem:[#allocation11] ss:$0 sm:$0xff] }
 0x2c8   :  { %v4594_v0 = vadd.f32 %v2962_v29, %v535_v26  ;;  %v2964_v30 = vpop.f32.mrb[6].mxu0 }
 0x2c9   :  { %v4593_v31 = vadd.f32 %v4592_v28, %v5101_v45  ;;  %v2965_v32 = vpop.f32.mrb[7].mxu0 }
 0x2ca   :  { %v4595_v38 = vadd.f32 %v4594_v0, %v5103_v47 }
 0x2cb   :  { %v3176_v33 = vpack.c.bf16 %v4593_v31, %v4593_v31 }
 0x2cc   :  { %v3177_v34 = vpack.c.bf16 %v4595_v38, %v4595_v38 }
 0x2cd   :  { %v3184_v37 = vmul.bf16 %v3176_v33, %v3176_v33 }
 0x2ce   :  { %v3185_v35 = vmul.bf16 %v3177_v34, %v3177_v34 }
 0x2d0   :  { %3819 = vmatprep.mubr.bf16.mxu0 %v3185_v35 }
 0x2d1   :  { %3820 = vmatmul.mubr.bf16.vlgmr.msra.gmra.mrb[12].mxu0 %v3184_v37 }
 0x2d2   :  { %4567 = vmatpush3.bf16.msra.mxu0 %v4716_v5  ;;  %4582 = vmatprep.mubr.msk.bf16.mxu0 %vm4900_vm1, %v4899_v6 }
 0x2d3   :  { %4568 = vmatprep.subr.bf16.mxu0 %v4899_v6 }
 0x2d6   :  { %4569 = vmatpush3.bf16.msra.mxu0 %v4717_v7 }
 0x2d7   :  { %4570 = vmatprep.subr.bf16.mxu0 %v4899_v6 }
 0x2da   :  { %4571 = vmatpush3.bf16.msra.mxu0 %v4718_v8 }
 0x2db   :  { %4572 = vmatprep.subr.bf16.mxu0 %v4899_v6 }
 0x2de   :  { %4573 = vmatpush3.bf16.msra.mxu0 %v4719_v9 }
 0x2df   :  { %4574 = vmatprep.subr.bf16.mxu0 %v4899_v6 }
 0x2e2   :  { %4575 = vmatpush3.bf16.msra.mxu0 %v4720_v10 }
 0x2e3   :  { %4576 = vmatprep.subr.bf16.mxu0 %v4899_v6 }
 0x2e6   :  { %v4485_v43 = vpop.f32.mrb[8].mxu0  ;;  %4577 = vmatpush3.bf16.msra.mxu0 %v4721_v20 }
 0x2e7   :  { %v4486_v19 = vpop.f32.mrb[9].mxu0  ;;  %4578 = vmatprep.subr.bf16.mxu0 %v4899_v6 }
 0x2e8   :  { %v4487_v44 = vadd.f32 %v4486_v19, %v4485_v43  ;;  %v4488_v48 = vpop.f32.mrb[10].mxu0 }
 0x2e9   :  { %v4489_v45 = vpop.f32.mrb[11].mxu0 }
 0x2ea   :  { %v3742_v60 = vadd.f32 %v4487_v44, %v4395_v46  ;;  %4579 = vmatpush3.bf16.msra.mxu0 %v4722_v11 }
 0x2eb   :  { %4580 = vmatprep.subr.bf16.mxu0 %v4899_v6 }
 0x2ec   :  { %v3165_v47 = vpop.f32.mrb[12].mxu1 }
 0x2ed   :  { %v4596_v52 = vadd.f32 %v3165_v47, %v539_v49  ;;  %v3167_v53 = vpop.f32.mrb[13].mxu1 }
 0x2ee   :  { %v4597_v54 = vadd.f32 %v3167_v53, %v543_v50  ;;  %v3169_v55 = vpop.f32.mrb[14].mxu1  ;;  %4581 = vmatpush3.bf16.msra.mxu0 %v4723_v12 }
 0x2ef   :  { %v3178_v57 = vpack.c.bf16 %v4596_v52, %v4596_v52  ;;  %v3170_v58 = vpop.f32.mrb[15].mxu1 }
 0x2f0   :  { %v3179_v59 = vpack.c.bf16 %v4597_v54, %v4597_v54 }
 0x2f1   :  { %v3186_v62 = vmul.bf16 %v3178_v57, %v3178_v57 }
 0x2f2   :  { %v3187_v61 = vmul.bf16 %v3179_v59, %v3179_v59 }
 0x2f4   :  { %3859 = vmatprep.mubr.bf16.mxu1 %v3187_v61 }
 0x2f5   :  { %3860 = vmatmul.mubr.bf16.vlgmr.msra.gmra.mrb[20].mxu1 %v3186_v62 }
 0x30c   :  { %v4507_v63 = vpop.f32.mrb[16].mxu1 }
 0x30d   :  { %v4508_v1 = vpop.f32.mrb[17].mxu1 }
 0x30e   :  { %v4509_v2 = vadd.f32 %v4508_v1, %v4507_v63  ;;  %v4510_v3 = vpop.f32.mrb[18].mxu1 }
 0x30f   :  { %v4511_v4 = vpop.f32.mrb[19].mxu1 }
 0x310   :  { %v3782_v56 = vadd.f32 %v4509_v2, %v3742_v60 }
 0x3a4   :  { %v4529_v13 = vpop.f32.mrb[12].mxu0 }
 0x3a5   :  { %v4530_v14 = vpop.f32.mrb[13].mxu0 }
 0x3a6   :  { %v4531_v15 = vadd.f32 %v4530_v14, %v4529_v13  ;;  %v4532_v16 = vpop.f32.mrb[14].mxu0 }
 0x3a7   :  { %v4533_v17 = vpop.f32.mrb[15].mxu0 }
 0x3a8   :  { %v3822_v24 = vadd.f32 %v4531_v15, %v3782_v56 }
 0x3c8   :  { %v4551_v18 = vpop.f32.mrb[20].mxu1 }
 0x3c9   :  { %v4552_v21 = vpop.f32.mrb[21].mxu1 }
 0x3ca   :  { %v4553_v22 = vadd.f32 %v4552_v21, %v4551_v18  ;;  %v4554_v39 = vpop.f32.mrb[22].mxu1 }
 0x3cb   :  { %v4555_v23 = vpop.f32.mrb[23].mxu1 }
 0x3cc   :  { %v3862_v42 = vadd.f32 %v4553_v22, %v3822_v24 }
 0x3ce   :  { %v3867_v25 = vpack.c.bf16 %v3862_v42, %v3862_v42 }
 0x3d0   :  { %v3868_v51 = vmul.bf16 %v3867_v25, %v3867_v25 }
 0x3d2   :  { %4583 = vmatmul.mubr.bf16.vlgmr.msra.gmra.mrb[16].mxu0 %v3868_v51 }
 0x4a5   :  { %v3974_v26 = vpop.f32.mrb[16].mxu0 }
 0x4a6   :  { %v3975_v27 = vadd.f32 %v4460_v36, %v3974_v26  ;;  %v4584_v28 = vpop.f32.mrb[17].mxu0 }
 0x4a7   :  { %v3977_v29 = vpop.f32.mrb[18].mxu0 }
 0x4a8   :  { %3980 = vst [vmem:[#allocation13] sm:$0xff] %v3975_v27  ;;  %v4585_v0 = vpop.f32.mrb[19].mxu0 }
 0x4a9   :  { %4867 = shalt.err (!%p4864_p10)
}
 0x4aa   :  { %s4868_s16 = scalar_lea.hbm %s5136_s7, 128 }
 0x4ab   :  { %p4869_p11 = scmp.ne.s32.totalorder %s5136_s7, %s4868_s16  ;;  %p4872_p12 = scmp.lt.u32.totalorder %s4868_s16, %s5136_s7 }
 0x4ad   :  { %p4874_p13 = pnand %p4872_p12, %p4869_p11 }
 0x4af   :  { %4877 = shalt.err (!%p4874_p13)
}
 0x4b0   :  { %3990 = dma.vmem_to_hbm [thread:$0]  %s3988_s13, 128, %s5136_s7, [#allocation4]  }
 0x4b1   :  { %4886 = dma.done.wait [#allocation4], 128  }
 0x4b2   :  { %4887 = vsyncadd [#allocation4], 4294967168 }
 0x4b3   :  { %3994 = vsyncpa [#allocation3], 1 }
 0x4b4   :  { %3995 = vsyncpa [#allocation6], 1 }
 0x4b5   :  { %3996 = vsyncpa [#allocation9], 1 }
 0x4b6   :  { %3997 = vsyncpa [#allocation12], 1 }
 0x4b7   :  { %3998 = vsyncpa [#allocation4], 1 }

</bundles_post_ra>
